<compile_context>
chip_gen: v6e
topology: v6e:2x2x1
jax: 0.10.0
libtpu: 0.0.40
codegen_flags: <defaults>
</compile_context>

<pallas_src>
import functools

import jax
import jax.numpy as jnp
from jax import lax
from jax.experimental import pallas as pl
from jax.experimental.pallas import tpu as pltpu


# ----------------------------------------------------------------------------
# Shared LayerNorm + multi-head self-attention tail (q = k = v = LN(x)).
# x: (t, bs, c) float32 with rotary already applied.  Writes o_ref in place
# with a single full-width store.
# ----------------------------------------------------------------------------
def _ln_attn(x, w_ref, b_ref, o_ref, *, n_head, d_head, scale, mm_dtype,
             eps=1e-5):
    mu = jnp.mean(x, axis=-1, keepdims=True)
    var = jnp.mean((x - mu) ** 2, axis=-1, keepdims=True)
    y = (x - mu) * lax.rsqrt(var + eps) * w_ref[...][None] + b_ref[...][None]

    # one major-dim transpose: sequences (bs) leading for batched MXU matmuls
    y = jnp.transpose(y, (1, 0, 2))                                # (bs, t, c)

    # TODO(synk): for very large n_head, move heads onto a grid axis or a
    # lax.fori_loop to bound live ranges; typical n_head <= 8 is fine unrolled.
    head_outs = []
    for hh in range(n_head):
        qh = y[:, :, hh * d_head:(hh + 1) * d_head].astype(mm_dtype)  # (bs,t,d)
        s = jnp.einsum('bqd,bkd->bqk', qh, qh,
                       preferred_element_type=jnp.float32) * scale
        s = s - jnp.max(s, axis=-1, keepdims=True)
        e = jnp.exp(s)
        # exact normalization (the approx reciprocal caused the 1e-2 mismatch)
        p = (e * (1.0 / jnp.sum(e, axis=-1, keepdims=True))).astype(mm_dtype)
        head_outs.append(jnp.einsum('bqk,bkd->bqd', p, qh,
                                    preferred_element_type=jnp.float32))

    o = jnp.concatenate(head_outs, axis=-1)                        # (bs, t, c)
    o_ref[...] = jnp.transpose(o, (1, 0, 2)).astype(o_ref.dtype)   # full store


# ----------------------------------------------------------------------------
# Kernel (preferred path): rotary via two XLU lane rolls + folded sin tables.
#   out[j] = x[j]*cos[j] + roll(x,1)[j]*s1[j] + roll(x,c-1)[j]*s2[j]
# x_ref block: (t, bs, c) in storage dtype.
# ----------------------------------------------------------------------------
def _rotary_roll_kernel(x_ref, cos_ref, s1_ref, s2_ref, w_ref, b_ref, o_ref,
                        *, n_head, d_head, scale, mm_dtype):
    c = x_ref.shape[-1]
    xs = x_ref[...]
    if xs.dtype == jnp.bfloat16:
        # roll the packed bf16 block first (half the XLU traffic), cast after
        r1 = pltpu.roll(xs, 1, axis=-1).astype(jnp.float32)
        r2 = pltpu.roll(xs, c - 1, axis=-1).astype(jnp.float32)
        x = xs.astype(jnp.float32)
    else:
        x = xs.astype(jnp.float32)
        r1 = pltpu.roll(x, 1, axis=-1)
        r2 = pltpu.roll(x, c - 1, axis=-1)
    x = (x * cos_ref[...][:, None, :]
         + r1 * s1_ref[...][:, None, :]
         + r2 * s2_ref[...][:, None, :])
    _ln_attn(x, w_ref, b_ref, o_ref, n_head=n_head, d_head=d_head,
             scale=scale, mm_dtype=mm_dtype)


# ----------------------------------------------------------------------------
# Kernel (fallback path): rotate_half as a (c, c) permutation matmul.
# ----------------------------------------------------------------------------
def _rotary_perm_kernel(x_ref, cos_ref, sin_ref, perm_ref, w_ref, b_ref, o_ref,
                        *, n_head, d_head, scale, mm_dtype):
    x = x_ref[...].astype(jnp.float32)                             # (t, bs, c)
    x_rot = jnp.einsum('tsc,cd->tsd', x, perm_ref[...],
                       preferred_element_type=jnp.float32)
    x = (x * cos_ref[...][:, None, :] + x_rot * sin_ref[...][:, None, :])
    _ln_attn(x, w_ref, b_ref, o_ref, n_head=n_head, d_head=d_head,
             scale=scale, mm_dtype=mm_dtype)


# ----------------------------------------------------------------------------
# Tiny probe: which direction does pltpu.roll rotate?  ('fwd' == jnp.roll,
# 'rev' == mirrored, None -> roll unusable -> permutation-matmul fallback.)
# ----------------------------------------------------------------------------
@functools.lru_cache(maxsize=None)
def _roll_mode(c: int):
    def probe(x_ref, o_ref):
        o_ref[...] = pltpu.roll(x_ref[...], 1, axis=-1)

    x = jnp.broadcast_to(jnp.arange(c, dtype=jnp.float32), (2, 8, c))
    try:
        out = pl.pallas_call(
            probe, out_shape=jax.ShapeDtypeStruct((2, 8, c), jnp.float32))(x)
        out = jax.block_until_ready(out)
    except Exception:
        return None
    if bool(jnp.allclose(out, jnp.roll(x, 1, axis=-1))):
        return "fwd"
    if bool(jnp.allclose(out, jnp.roll(x, -1, axis=-1))):
        return "rev"
    return None


# ----------------------------------------------------------------------------
# Generation-aware VMEM sizing + block selection along the fused h*w axis.
# ----------------------------------------------------------------------------
def _auto_vmem(budget_frac=0.30, limit_frac=0.70):
    cap = None
    try:
        info = pltpu.get_tpu_info()
        cap = getattr(info, "vmem_capacity_bytes", None)
    except Exception:
        cap = None
    if not cap:
        cap = 64 * 1024 * 1024          # conservative default (v7x per-core)
    return int(cap * budget_frac), int(cap * limit_frac)


def _vmem_per_step(bs, t, c, n_head, itemsize):
    blk = t * bs * c
    io = 2 * 2 * blk * itemsize                    # double-buffered in + out
    temps = 6 * blk * 4                            # f32 rotary/LN/transpose/assembly
    live_heads = max(2, min(n_head, 4))            # unrolled head loop headroom
    scores = 3 * bs * t * t * 4 * live_heads
    tables = 4 * t * c * 4 + c * c * 4
    return io + temps + scores + tables


def _choose_block_s(b, S, t, c, n_head, itemsize, budget):
    # candidates: multiple-of-8 divisors of S (sublane constraint) plus full S
    cands = sorted({d for d in range(8, S + 1, 8) if S % d == 0} | {S})
    fits = [bs for bs in cands
            if _vmem_per_step(bs, t, c, n_head, itemsize) <= budget]
    if not fits:
        return cands[0]
    # biggest block that still leaves enough grid steps (>=8 ideally, >=2 min)
    for min_steps in (8, 2, 1):
        ok = [bs for bs in fits if b * (S // bs) >= min_steps]
        if ok:
            return max(ok)
    return fits[0]


# ----------------------------------------------------------------------------
# Wrapper: free reshapes only (no HBM transposes), constant tables, pallas_call.
# ----------------------------------------------------------------------------
def temporal_attention(video, ln_w, ln_b, *, n_head: int, d_head: int,
                       block_s: int = None, theta: float = 10000.0,
                       matmul_dtype=jnp.bfloat16,
                       vmem_budget_bytes: int = None,
                       vmem_limit_bytes: int = None):
    b, t, h, w, c = video.shape
    assert c == n_head * d_head, "module is only runnable when d_inp == n_head*d_head"
    assert c % 2 == 0, "interleaved rotary needs an even channel dim"
    S = h * w
    dtype = video.dtype
    itemsize = jnp.dtype(dtype).itemsize

    # free reshape (adjacent dims merged): NO HBM transpose pass
    x = video.reshape(b, t, S, c)

    # rotary tables (RotaryEmbedding kind='1d', interpolate_factor=1, offset=0)
    half = c // 2
    inv_freq = 1.0 / (theta ** (jnp.arange(0, c, 2, dtype=jnp.float32)[:half] / c))
    pos = jnp.arange(t, dtype=jnp.float32)
    freqs = jnp.repeat(pos[:, None] * inv_freq[None, :], 2, axis=-1)   # (t, c)
    cos_tab = jnp.cos(freqs)
    sin_tab = jnp.sin(freqs)

    budget_default, limit_default = _auto_vmem()
    budget = vmem_budget_bytes or budget_default
    limit = vmem_limit_bytes or limit_default

    if block_s is None:
        block_s = _choose_block_s(b, S, t, c, n_head, itemsize, budget)
    assert S % block_s == 0, (S, block_s)
    scale = n_head * d_head ** (-0.5)

    mode = _roll_mode(c)
    if mode is not None:
        # fold rotate_half's sign + even/odd selection into the tables:
        #   A[j]  = +sin[j] for odd j, 0 otherwise    (x[2i]    -> slot 2i+1)
        #   Bm[j] = -sin[j] for even j, 0 otherwise   (-x[2i+1] -> slot 2i)
        odd = (jnp.arange(c) % 2 == 1)
        a_tab = jnp.where(odd, sin_tab, 0.0)
        b_tab = jnp.where(odd, 0.0, -sin_tab)
        s1_tab, s2_tab = (a_tab, b_tab) if mode == "fwd" else (b_tab, a_tab)
        kernel = functools.partial(_rotary_roll_kernel, n_head=n_head,
                                   d_head=d_head, scale=scale,
                                   mm_dtype=matmul_dtype)
        tables = (cos_tab, s1_tab, s2_tab)
        table_specs = [pl.BlockSpec((t, c), lambda bi, si: (0, 0)),
                       pl.BlockSpec((t, c), lambda bi, si: (0, 0)),
                       pl.BlockSpec((t, c), lambda bi, si: (0, 0))]
    else:
        even = jnp.arange(0, c, 2)
        perm = jnp.zeros((c, c), jnp.float32)
        perm = perm.at[even + 1, even].set(-1.0)
        perm = perm.at[even, even + 1].set(1.0)
        kernel = functools.partial(_rotary_perm_kernel, n_head=n_head,
                                   d_head=d_head, scale=scale,
                                   mm_dtype=matmul_dtype)
        tables = (cos_tab, sin_tab, perm)
        table_specs = [pl.BlockSpec((t, c), lambda bi, si: (0, 0)),
                       pl.BlockSpec((t, c), lambda bi, si: (0, 0)),
                       pl.BlockSpec((c, c), lambda bi, si: (0, 0))]

    grid = (b, S // block_s)

    flops = 4 * b * S * t * t * c                      # QK^T + PV
    if mode is None:
        flops += 2 * b * S * t * c * c                 # permutation-matmul fallback
    cost = pl.CostEstimate(
        flops=int(flops),
        transcendentals=int(b * S * n_head * t * t),
        bytes_accessed=int(2 * b * t * S * c * itemsize))

    out = pl.pallas_call(
        kernel,
        out_shape=jax.ShapeDtypeStruct((b, t, S, c), dtype),
        grid_spec=pltpu.PrefetchScalarGridSpec(
            num_scalar_prefetch=0,
            grid=grid,
            in_specs=[pl.BlockSpec((None, t, block_s, c),
                                   lambda bi, si: (bi, 0, si, 0))]
                     + table_specs
                     + [pl.BlockSpec((1, c), lambda bi, si: (0, 0)),
                        pl.BlockSpec((1, c), lambda bi, si: (0, 0))],
            out_specs=pl.BlockSpec((None, t, block_s, c),
                                   lambda bi, si: (bi, 0, si, 0)),
        ),
        compiler_params=pltpu.CompilerParams(
            dimension_semantics=("parallel", "parallel"),
            vmem_limit_bytes=int(limit)),
        cost_estimate=cost,
    )(x, *tables,
      ln_w.reshape(1, c).astype(jnp.float32),
      ln_b.reshape(1, c).astype(jnp.float32))

    # free reshape back (adjacent dims split): NO HBM transpose pass
    return out.reshape(b, t, h, w, c)


# ----------------------------------------------------------------------------
# Pure-JAX reference (mirrors the PyTorch forward exactly) for validation.
# ----------------------------------------------------------------------------
def _rotate_half(x):
    x = x.reshape(*x.shape[:-1], -1, 2)
    x1, x2 = x[..., 0], x[..., 1]
    out = jnp.stack([-x2, x1], axis=-1)
    return out.reshape(*out.shape[:-2], -1)


def reference_forward(video, ln_w, ln_b, *, n_head, d_head, theta=10000.0):
    b, t, h, w, c = video.shape
    x = jnp.transpose(video, (0, 2, 3, 1, 4)).reshape(-1, t, c).astype(jnp.float32)
    half = c // 2
    inv_freq = 1.0 / (theta ** (jnp.arange(0, c, 2, dtype=jnp.float32)[:half] / c))
    freqs = jnp.repeat(jnp.arange(t, dtype=jnp.float32)[:, None] * inv_freq[None, :],
                       2, axis=-1)
    x = x * jnp.cos(freqs) + _rotate_half(x) * jnp.sin(freqs)
    mu = x.mean(-1, keepdims=True)
    var = ((x - mu) ** 2).mean(-1, keepdims=True)
    y = (x - mu) / jnp.sqrt(var + 1e-5) * ln_w + ln_b
    q = y.reshape(-1, t, n_head, d_head).transpose(0, 2, 1, 3)   # (B, h, t, d)
    scale = n_head * d_head ** (-0.5)
    hp = lax.Precision.HIGHEST
    s = jnp.einsum('bhqd,bhkd->bhqk', q, q, precision=hp) * scale
    p = jax.nn.softmax(s, axis=-1)
    o = jnp.einsum('bhqk,bhkd->bhqd', p, q, precision=hp)
    o = o.transpose(0, 2, 1, 3).reshape(b, h, w, t, c)
    return jnp.transpose(o, (0, 3, 1, 2, 4))


if __name__ == "__main__":
    # small, module-consistent shapes
    n_head, d_head = 2, 16
    c = n_head * d_head            # d_inp == n_head*d_head (required by the module)
    b, t, h, w = 2, 8, 4, 4

    key = jax.random.PRNGKey(0)
    k_v, k_w, k_b = jax.random.split(key, 3)
    video = jax.random.normal(k_v, (b, t, h, w, c), dtype=jnp.float32)
    ln_w = 1.0 + 0.1 * jax.random.normal(k_w, (c,), dtype=jnp.float32)
    ln_b = 0.1 * jax.random.normal(k_b, (c,), dtype=jnp.float32)

    ref = jax.block_until_ready(
        reference_forward(video, ln_w, ln_b, n_head=n_head, d_head=d_head))

    # strict path: f32 MXU operands -> must match the f32 oracle tightly
    out_f32 = jax.block_until_ready(
        temporal_attention(video, ln_w, ln_b, n_head=n_head, d_head=d_head,
                           matmul_dtype=jnp.float32))
    assert out_f32.shape == (b, t, h, w, c), out_f32.shape
    err = float(jnp.max(jnp.abs(out_f32 - ref)))
    assert err < 2e-3, f"f32 path max abs err {err}"

    # default fast path: bf16 MXU operands, f32 accumulation (per perf review)
    out_bf = jax.block_until_ready(
        temporal_attention(video, ln_w, ln_b, n_head=n_head, d_head=d_head))
    err_bf = float(jnp.max(jnp.abs(out_bf - ref)))
    mean_bf = float(jnp.mean(jnp.abs(out_bf - ref)))
    assert err_bf < 6e-2, f"bf16 path max abs err {err_bf}"
    assert mean_bf < 1.5e-2, f"bf16 path mean abs err {mean_bf}"

    print("KERNEL_OK")
</pallas_src>

<mosaic_0001>
module attributes {stable_mosaic.version = 11 : i64} {
  func.func @_rotary_perm_kernel(%arg0: i32, %arg1: i32, %arg2: memref<1x8x16x32xf32, #tpu.memory_space<vmem>>, %arg3: memref<8x32xf32, #tpu.memory_space<vmem>>, %arg4: memref<8x32xf32, #tpu.memory_space<vmem>>, %arg5: memref<32x32xf32, #tpu.memory_space<vmem>>, %arg6: memref<1x32xf32, #tpu.memory_space<vmem>>, %arg7: memref<1x32xf32, #tpu.memory_space<vmem>>, %arg8: memref<1x8x16x32xf32, #tpu.memory_space<vmem>>) attributes {dimension_semantics = [#tpu.dimension_semantics<parallel>, #tpu.dimension_semantics<parallel>], iteration_bounds = array<i64: 2, 1>, scalar_prefetch = 0 : i64, scratch_operands = 0 : i64, tpu.core_type = #tpu.core_type<tc>, window_params = [{transform_indices = @transform_0, window_bounds = array<i64: 1, 8, 16, 32>}, {pipeline_mode = #tpu.pipeline_mode<synchronous>, transform_indices = @transform_1, window_bounds = array<i64: 8, 32>}, {pipeline_mode = #tpu.pipeline_mode<synchronous>, transform_indices = @transform_2, window_bounds = array<i64: 8, 32>}, {pipeline_mode = #tpu.pipeline_mode<synchronous>, transform_indices = @transform_3, window_bounds = array<i64: 32, 32>}, {pipeline_mode = #tpu.pipeline_mode<synchronous>, transform_indices = @transform_4, window_bounds = array<i64: 1, 32>}, {pipeline_mode = #tpu.pipeline_mode<synchronous>, transform_indices = @transform_5, window_bounds = array<i64: 1, 32>}, {transform_indices = @transform_6, window_bounds = array<i64: 1, 8, 16, 32>}]} {
    %c0 = arith.constant 0 : index
    %c0_0 = arith.constant 0 : index
    %c0_1 = arith.constant 0 : index
    %c0_2 = arith.constant 0 : index
    %0 = vector.load %arg2[%c0, %c0_0, %c0_1, %c0_2] : memref<1x8x16x32xf32, #tpu.memory_space<vmem>>, vector<1x8x16x32xf32>
    %1 = vector.shape_cast %0 : vector<1x8x16x32xf32> to vector<8x16x32xf32>
    %c0_3 = arith.constant 0 : index
    %c0_4 = arith.constant 0 : index
    %2 = vector.load %arg5[%c0_3, %c0_4] : memref<32x32xf32, #tpu.memory_space<vmem>>, vector<32x32xf32>
    "tpu.trace_start"() <{level = 10 : i32, message = "tsc,cd->tsd"}> : () -> ()
    %cst = arith.constant dense<0.000000e+00> : vector<8x16x32xf32>
    %3 = tpu.matmul %1, %2, %cst {dimension_numbers = #tpu.dot_dimension_numbers<[2], [0], [0, 1], [1], [0, 0, 0, 1, 1, 1], [], []>} : vector<8x16x32xf32>, vector<32x32xf32>, vector<8x16x32xf32> -> vector<8x16x32xf32>
    "tpu.trace_stop"() : () -> ()
    %c0_5 = arith.constant 0 : index
    %c0_6 = arith.constant 0 : index
    %4 = vector.load %arg3[%c0_5, %c0_6] : memref<8x32xf32, #tpu.memory_space<vmem>>, vector<8x32xf32>
    %5 = vector.shape_cast %4 : vector<8x32xf32> to vector<8x1x32xf32>
    %6 = vector.broadcast %5 : vector<8x1x32xf32> to vector<8x16x32xf32>
    %7 = arith.mulf %1, %6 : vector<8x16x32xf32>
    %c0_7 = arith.constant 0 : index
    %c0_8 = arith.constant 0 : index
    %8 = vector.load %arg4[%c0_7, %c0_8] : memref<8x32xf32, #tpu.memory_space<vmem>>, vector<8x32xf32>
    %9 = vector.shape_cast %8 : vector<8x32xf32> to vector<8x1x32xf32>
    %10 = vector.broadcast %9 : vector<8x1x32xf32> to vector<8x16x32xf32>
    %11 = arith.mulf %3, %10 : vector<8x16x32xf32>
    %12 = arith.addf %7, %11 : vector<8x16x32xf32>
    %cst_9 = arith.constant dense<0.000000e+00> : vector<8x16xf32>
    %13 = vector.multi_reduction <add>, %12, %cst_9 [2] : vector<8x16x32xf32> to vector<8x16xf32>
    %14 = vector.shape_cast %13 : vector<8x16xf32> to vector<8x16x1xf32>
    %cst_10 = arith.constant 3.200000e+01 : f32
    %15 = vector.broadcast %cst_10 : f32 to vector<8x16x1xf32>
    %16 = arith.divf %14, %15 : vector<8x16x1xf32>
    %17 = vector.broadcast %16 : vector<8x16x1xf32> to vector<8x16x32xf32>
    %18 = arith.subf %12, %17 : vector<8x16x32xf32>
    %19 = arith.mulf %18, %18 : vector<8x16x32xf32>
    %cst_11 = arith.constant dense<0.000000e+00> : vector<8x16xf32>
    %20 = vector.multi_reduction <add>, %19, %cst_11 [2] : vector<8x16x32xf32> to vector<8x16xf32>
    %21 = vector.shape_cast %20 : vector<8x16xf32> to vector<8x16x1xf32>
    %cst_12 = arith.constant 3.200000e+01 : f32
    %22 = vector.broadcast %cst_12 : f32 to vector<8x16x1xf32>
    %23 = arith.divf %21, %22 : vector<8x16x1xf32>
    %24 = vector.broadcast %16 : vector<8x16x1xf32> to vector<8x16x32xf32>
    %25 = arith.subf %12, %24 : vector<8x16x32xf32>
    %cst_13 = arith.constant 9.99999974E-6 : f32
    %26 = vector.broadcast %cst_13 : f32 to vector<8x16x1xf32>
    %27 = arith.addf %23, %26 : vector<8x16x1xf32>
    %28 = math.rsqrt %27 : vector<8x16x1xf32>
    %29 = vector.broadcast %28 : vector<8x16x1xf32> to vector<8x16x32xf32>
    %30 = arith.mulf %25, %29 : vector<8x16x32xf32>
    %c0_14 = arith.constant 0 : index
    %c0_15 = arith.constant 0 : index
    %31 = vector.load %arg6[%c0_14, %c0_15] : memref<1x32xf32, #tpu.memory_space<vmem>>, vector<1x32xf32>
    %32 = vector.shape_cast %31 : vector<1x32xf32> to vector<1x1x32xf32>
    %33 = vector.broadcast %32 : vector<1x1x32xf32> to vector<8x16x32xf32>
    %34 = arith.mulf %30, %33 : vector<8x16x32xf32>
    %c0_16 = arith.constant 0 : index
    %c0_17 = arith.constant 0 : index
    %35 = vector.load %arg7[%c0_16, %c0_17] : memref<1x32xf32, #tpu.memory_space<vmem>>, vector<1x32xf32>
    %36 = vector.shape_cast %35 : vector<1x32xf32> to vector<1x1x32xf32>
    %37 = vector.broadcast %36 : vector<1x1x32xf32> to vector<8x16x32xf32>
    %38 = arith.addf %34, %37 : vector<8x16x32xf32>
    %39 = tpu.transpose %38, [1, 0, 2] : vector<8x16x32xf32> -> vector<16x8x32xf32>
    %40 = vector.extract_strided_slice %39 {offsets = [0, 0, 0], sizes = [16, 8, 16], strides = [1, 1, 1]} : vector<16x8x32xf32> to vector<16x8x16xf32>
    "tpu.trace_start"() <{level = 10 : i32, message = "bqd,bkd->bqk"}> : () -> ()
    %cst_18 = arith.constant dense<0.000000e+00> : vector<16x8x8xf32>
    %41 = tpu.matmul %40, %40, %cst_18 {dimension_numbers = #tpu.dot_dimension_numbers<[2], [2], [1], [1], [0, 0, 0, 1, 1, 1], [0], [0]>} : vector<16x8x16xf32>, vector<16x8x16xf32>, vector<16x8x8xf32> -> vector<16x8x8xf32>
    "tpu.trace_stop"() : () -> ()
    %cst_19 = arith.constant 5.000000e-01 : f32
    %42 = vector.broadcast %cst_19 : f32 to vector<16x8x8xf32>
    %43 = arith.mulf %41, %42 : vector<16x8x8xf32>
    %cst_20 = arith.constant dense<0xFF800000> : vector<16x8xf32>
    %44 = vector.multi_reduction <maximumf>, %43, %cst_20 [2] : vector<16x8x8xf32> to vector<16x8xf32>
    %45 = vector.shape_cast %44 : vector<16x8xf32> to vector<16x8x1xf32>
    %46 = vector.broadcast %45 : vector<16x8x1xf32> to vector<16x8x8xf32>
    %47 = arith.subf %43, %46 : vector<16x8x8xf32>
    %48 = math.exp %47 : vector<16x8x8xf32>
    %cst_21 = arith.constant dense<0.000000e+00> : vector<16x8xf32>
    %49 = vector.multi_reduction <add>, %48, %cst_21 [2] : vector<16x8x8xf32> to vector<16x8xf32>
    %50 = vector.shape_cast %49 : vector<16x8xf32> to vector<16x8x1xf32>
    %cst_22 = arith.constant 1.000000e+00 : f32
    %51 = vector.broadcast %cst_22 : f32 to vector<16x8x1xf32>
    %52 = arith.divf %51, %50 : vector<16x8x1xf32>
    %53 = vector.broadcast %52 : vector<16x8x1xf32> to vector<16x8x8xf32>
    %54 = arith.mulf %48, %53 : vector<16x8x8xf32>
    "tpu.trace_start"() <{level = 10 : i32, message = "bqk,bkd->bqd"}> : () -> ()
    %cst_23 = arith.constant dense<0.000000e+00> : vector<16x8x16xf32>
    %55 = tpu.matmul %54, %40, %cst_23 {dimension_numbers = #tpu.dot_dimension_numbers<[2], [1], [1], [2], [0, 0, 0, 1, 1, 2], [0], [0]>} : vector<16x8x8xf32>, vector<16x8x16xf32>, vector<16x8x16xf32> -> vector<16x8x16xf32>
    "tpu.trace_stop"() : () -> ()
    %56 = vector.extract_strided_slice %39 {offsets = [0, 0, 16], sizes = [16, 8, 16], strides = [1, 1, 1]} : vector<16x8x32xf32> to vector<16x8x16xf32>
    "tpu.trace_start"() <{level = 10 : i32, message = "bqd,bkd->bqk"}> : () -> ()
    %cst_24 = arith.constant dense<0.000000e+00> : vector<16x8x8xf32>
    %57 = tpu.matmul %56, %56, %cst_24 {dimension_numbers = #tpu.dot_dimension_numbers<[2], [2], [1], [1], [0, 0, 0, 1, 1, 1], [0], [0]>} : vector<16x8x16xf32>, vector<16x8x16xf32>, vector<16x8x8xf32> -> vector<16x8x8xf32>
    "tpu.trace_stop"() : () -> ()
    %cst_25 = arith.constant 5.000000e-01 : f32
    %58 = vector.broadcast %cst_25 : f32 to vector<16x8x8xf32>
    %59 = arith.mulf %57, %58 : vector<16x8x8xf32>
    %cst_26 = arith.constant dense<0xFF800000> : vector<16x8xf32>
    %60 = vector.multi_reduction <maximumf>, %59, %cst_26 [2] : vector<16x8x8xf32> to vector<16x8xf32>
    %61 = vector.shape_cast %60 : vector<16x8xf32> to vector<16x8x1xf32>
    %62 = vector.broadcast %61 : vector<16x8x1xf32> to vector<16x8x8xf32>
    %63 = arith.subf %59, %62 : vector<16x8x8xf32>
    %64 = math.exp %63 : vector<16x8x8xf32>
    %cst_27 = arith.constant dense<0.000000e+00> : vector<16x8xf32>
    %65 = vector.multi_reduction <add>, %64, %cst_27 [2] : vector<16x8x8xf32> to vector<16x8xf32>
    %66 = vector.shape_cast %65 : vector<16x8xf32> to vector<16x8x1xf32>
    %cst_28 = arith.constant 1.000000e+00 : f32
    %67 = vector.broadcast %cst_28 : f32 to vector<16x8x1xf32>
    %68 = arith.divf %67, %66 : vector<16x8x1xf32>
    %69 = vector.broadcast %68 : vector<16x8x1xf32> to vector<16x8x8xf32>
    %70 = arith.mulf %64, %69 : vector<16x8x8xf32>
    "tpu.trace_start"() <{level = 10 : i32, message = "bqk,bkd->bqd"}> : () -> ()
    %cst_29 = arith.constant dense<0.000000e+00> : vector<16x8x16xf32>
    %71 = tpu.matmul %70, %56, %cst_29 {dimension_numbers = #tpu.dot_dimension_numbers<[2], [1], [1], [2], [0, 0, 0, 1, 1, 2], [0], [0]>} : vector<16x8x8xf32>, vector<16x8x16xf32>, vector<16x8x16xf32> -> vector<16x8x16xf32>
    "tpu.trace_stop"() : () -> ()
    %72 = tpu.concatenate %55, %71 in 2 : vector<16x8x16xf32>, vector<16x8x16xf32> -> vector<16x8x32xf32>
    %73 = tpu.transpose %72, [1, 0, 2] : vector<16x8x32xf32> -> vector<8x16x32xf32>
    %c0_30 = arith.constant 0 : index
    %c0_31 = arith.constant 0 : index
    %c0_32 = arith.constant 0 : index
    %c0_33 = arith.constant 0 : index
    %74 = vector.load %arg8[%c0_30, %c0_31, %c0_32, %c0_33] : memref<1x8x16x32xf32, #tpu.memory_space<vmem>>, vector<1x8x16x32xf32>
    %75 = vector.shape_cast %74 : vector<1x8x16x32xf32> to vector<8x16x32xf32>
    %76 = vector.shape_cast %73 : vector<8x16x32xf32> to vector<1x8x16x32xf32>
    tpu.vector_store %arg8[%c0_30, %c0_31, %c0_32, %c0_33], %76 {strides = array<i32>} : memref<1x8x16x32xf32, #tpu.memory_space<vmem>>, vector<1x8x16x32xf32>,
    return
  }
  func.func @transform_0(%arg0: i32, %arg1: i32) -> (i32, i32, i32, i32) {
    %c0_i32 = arith.constant 0 : i32
    %c0_i32_0 = arith.constant 0 : i32
    %c0_i32_1 = arith.constant 0 : i32
    return %arg0, %c0_i32, %arg1, %c0_i32_0 : i32, i32, i32, i32
  }
  func.func @transform_1(%arg0: i32, %arg1: i32) -> (i32, i32) {
    %c0_i32 = arith.constant 0 : i32
    %c0_i32_0 = arith.constant 0 : i32
    %c0_i32_1 = arith.constant 0 : i32
    return %c0_i32, %c0_i32_0 : i32, i32
  }
  func.func @transform_2(%arg0: i32, %arg1: i32) -> (i32, i32) {
    %c0_i32 = arith.constant 0 : i32
    %c0_i32_0 = arith.constant 0 : i32
    %c0_i32_1 = arith.constant 0 : i32
    return %c0_i32, %c0_i32_0 : i32, i32
  }
  func.func @transform_3(%arg0: i32, %arg1: i32) -> (i32, i32) {
    %c0_i32 = arith.constant 0 : i32
    %c0_i32_0 = arith.constant 0 : i32
    %c0_i32_1 = arith.constant 0 : i32
    return %c0_i32, %c0_i32_0 : i32, i32
  }
  func.func @transform_4(%arg0: i32, %arg1: i32) -> (i32, i32) {
    %c0_i32 = arith.constant 0 : i32
    %c0_i32_0 = arith.constant 0 : i32
    %c0_i32_1 = arith.constant 0 : i32
    return %c0_i32, %c0_i32_0 : i32, i32
  }
  func.func @transform_5(%arg0: i32, %arg1: i32) -> (i32, i32) {
    %c0_i32 = arith.constant 0 : i32
    %c0_i32_0 = arith.constant 0 : i32
    %c0_i32_1 = arith.constant 0 : i32
    return %c0_i32, %c0_i32_0 : i32, i32
  }
  func.func @transform_6(%arg0: i32, %arg1: i32) -> (i32, i32, i32, i32) {
    %c0_i32 = arith.constant 0 : i32
    %c0_i32_0 = arith.constant 0 : i32
    %c0_i32_1 = arith.constant 0 : i32
    return %arg0, %c0_i32, %arg1, %c0_i32_0 : i32, i32, i32, i32
  }
}

</mosaic_0001>

<bundles_post_ra>
// kernel: tpu_custom_call.1
= control target key start
LH: loop header
LB: loop body
LE: loop exit
PB: predicated region body
PF: predicated region fallthrough
CT: control target
= control target key end

     0   :  { %s9666_s0 = inlined_call_operand.hbm [shape: f32[2,8,16,32], index: 0, kind: input, shape index: {}]   ;;  %s9667_s1 = inlined_call_operand.hbm [shape: f32[8,32], index: 1, kind: input, shape index: {}]   ;;  %s9668_s2 = inlined_call_operand.hbm [shape: f32[8,32], index: 2, kind: input, shape index: {}]   ;;  %s9669_s3 = inlined_call_operand.hbm [shape: f32[32,32], index: 3, kind: input, shape index: {}]   ;;  %s9670_s4 = inlined_call_operand.vmem [shape: f32[1,32], index: 4, kind: input, shape index: {}]   ;;  %s9671_s5 = inlined_call_operand.vmem [shape: f32[1,32], index: 5, kind: input, shape index: {}]   ;;  %s9672_s6 = inlined_call_operand.hbm [shape: f32[2,8,16,32], index: 6, kind: output, shape index: {}]  }
   0x1   :  { %9679 = sst [smem:[#allocation15_spill]] %s9667_s1 }
   0x2   :  { %9680 = sst [smem:[#allocation16_spill]] %s9668_s2 }
   0x3   :  { %11 = vsyncpa [#allocation3], 0 }
   0x4   :  { %13 = vsyncpa [#allocation3 + $0x1], 0 }
   0x5   :  { %14 = vsyncpa [#allocation6], 0 }
   0x6   :  { %15 = vsyncpa [#allocation9], 0 }
   0x7   :  { %16 = vsyncpa [#allocation4], 0 }
   0x8   :  { %18 = vsyncpa [#allocation4 + $0x1], 0  ;;  %s8073_s21 = smov 0   ;;  %s8075_s22 = smov 0  }
   0x9   :  { %s8077_s23 = smov 0   ;;  %s8079_s24 = smov 0  }
   0xa   :  { %s8081_s25 = smov 0   ;;  %s8083_s26 = smov 0  }
   0xb LB: > { %s6923_s27 = sadd.s32 4294967295, %s8020_s26   ;;  %s6924_s28 = sadd.s32 4294967294, %s8020_s26   ;;  %s8020_s26 = sphi %s8083_s26, %s24_s26   ;;  %s8016_s25 = sphi %s8081_s25, %s9703_s25   ;;  %s8012_s24 = sphi %s8079_s24, %s9702_s24   ;;  %s8008_s23 = sphi %s8077_s23, %s9701_s23   ;;  %s8004_s22 = sphi %s8075_s22, %s9700_s22   ;;  %s8000_s21 = sphi %s8073_s21, %s9699_s21  }
   0xc   : > { %p58_p0 = scmp.ne.s32.totalorder %s8004_s22, %s8000_s21  ;;  %p8107_p1 = scmp.eq.s32.totalorder %s6923_s27, 0 }
   0xd   : > { %p8111_p2 = scmp.eq.s32.totalorder %s6923_s27, 1  ;;  %p195_p3 = scmp.eq.s32.totalorder %s6924_s28, 1 }
   0xe   : > { %s9681_s29 = scalar_select %p8107_p1, 1, 0 }
   0xf   : > { %s9682_s30 = scalar_select %p8111_p2, 1, 0 }
  0x10   : > { %p8117_p4 = por %p8107_p1, %p58_p0  ;;  %p6925_p5 = scmp.ge.s32.totalorder %s8020_s26, 1 }
  0x11   : > { %p8122_p6 = por %p195_p3, %p58_p0  ;;  %p202_p7 = scmp.lt.s32.totalorder %s8020_s26, 3 }
  0x12   : > { %s9683_s7 = scalar_select %p8117_p4, 1, 0 }
  0x13   : > { %s9684_s8 = scalar_select %p8122_p6, 1, 0 }
  0x14   : > { %p8127_p8 = pnand %p6925_p5, %p202_p7  ;;  %s8022_s10 = smov [#allocation5]  }
  0x15   : > { %s215_s11 = sshll.u32 %s8022_s10, 4  ;;  %s8023_s12 = smov [#allocation7]   ;;  %s216_s11 = int_to_ptr.vmem [resolvable:$true] %s215_s11 }
  0x16   : > { %s9685_s9 = scalar_select %p8127_p8, 1, 0 }
  0x17   : > { %p7576_p10 = pneg %p8127_p8  ;;  %s226_s13 = sshll.u32 %s8023_s12, 4  ;;  %s227_s13 = int_to_ptr.vmem [resolvable:$true] %s226_s13 }
  0x18   : > { %s8024_s15 = smov [#allocation8]   ;;  %s7837_s17 = scalar_lea.vmem %s216_s11, 128 }
  0x19   : > { %p8136_p11 = pnand %p7576_p10, %p8107_p1  ;;  %s236_s16 = sshll.u32 %s8024_s15, 4  ;;  %s8140_s16 = int_to_ptr.vmem [resolvable:$true] %s236_s16 }
  0x1a   : > { %p7838_p13 = scmp.ne.s32.totalorder %s216_s11, %s7837_s17  ;;  %p7845_p5 = scmp.lt.s32.totalorder %s216_s11, %s216_s11 }
  0x1b   : > { %p7828_p12 = pneg %p8136_p11  ;;  %p7846_p7 = scmp.lt.s32.totalorder %s7837_s17, %s7837_s17 }
  0x1d   : > { %p7840_p0 = pnand %p7838_p13, %p7828_p12  ;;  %p7847_p10 = por %p7846_p7, %p7845_p5 }
  0x1f   : > { %p7841_p3 = pneg %p7840_p0 }
  0x21   : > { %p7848_p9 = pnand %p7847_p10, %p7841_p3 }
  0x23   : > { %7851 = shalt.err (!%p7848_p9)
}
  0x24   : > { %s9687_s1 = sld [smem:[#allocation15_spill]]  ;;  %s7863_s20 = scalar_lea.vmem %s227_s13, 128 }
  0x25   : > { %p7864_p6 = scmp.ne.s32.totalorder %s227_s13, %s7863_s20  ;;  %p7871_p13 = scmp.lt.s32.totalorder %s227_s13, %s227_s13 }
  0x26   : > { %p7872_p0 = scmp.lt.s32.totalorder %s7863_s20, %s7863_s20 }
  0x27   : > { %p7866_p1 = pnand %p7864_p6, %p7828_p12 }
  0x28   : > { %p7873_p8 = por %p7872_p0, %p7871_p13 }
  0x29   : > { %p7867_p4 = pneg %p7866_p1 }
  0x2a   : > { %7579 = dma.hbm_to_vmem [thread:$0]  (!%p8136_p11), %s9687_s1, 128, %s216_s11, [#allocation6]  }
  0x2b   : > { %p7874_p2 = pnand %p7873_p8, %p7867_p4 }
  0x2d   : > { %7877 = shalt.err (!%p7874_p2)
}
  0x2e   : > { %s9688_s2 = sld [smem:[#allocation16_spill]]  ;;  %s7889_s10 = scalar_lea.vmem %s8140_s16, 512 }
  0x2f   : > { %p7890_p9 = scmp.ne.s32.totalorder %s8140_s16, %s7889_s10  ;;  %p7897_p3 = scmp.lt.s32.totalorder %s8140_s16, %s8140_s16 }
  0x30   : > { %p7898_p4 = scmp.lt.s32.totalorder %s7889_s10, %s7889_s10 }
  0x31   : > { %p7892_p1 = pnand %p7890_p9, %p7828_p12 }
  0x32   : > { %p7899_p2 = por %p7898_p4, %p7897_p3 }
  0x33   : > { %p7893_p6 = pneg %p7892_p1 }
  0x34   : > { %7582 = dma.hbm_to_vmem [thread:$0]  (!%p8136_p11), %s9688_s2, 128, %s227_s13, [#allocation6]  }
  0x35   : > { %p7900_p8 = pnand %p7899_p2, %p7893_p6 }
  0x37   : > { %7903 = shalt.err (!%p7900_p8)
}
  0x38   : > { %s9677_s11 = smov 128   ;;  %s9678_s12 = smov 8  }
  0x39   : > { %7585 = dma.hbm_to_vmem [thread:$0]  (!%p8136_p11), %s9669_s3, 512, %s8140_s16, [#allocation9], %s9677_s11, %s9677_s11, %s9678_s12  }
  0x3a   : > { %s45_s17 = sadd.s32 1, %s8008_s23  ;;  %s36_s18 = sadd.s32 1, %s8016_s25 }
  0x3b   : > { %p52_p12 = scmp.ne.s32.totalorder %s8008_s23, %s8004_s22  ;;  %p38_p5 = scmp.ge.s32.totalorder %s36_s18, 2 }
  0x3c   : > { %p53_p7 = scmp.eq.s32.totalorder %s8020_s26, 0  ;;  %p9689_p10 = scmp.ne.s32.totalorder %s9682_s30, 0 }
  0x3d   : > { %p7597_p0 = scmp.lt.s32.totalorder %s8020_s26, 2  ;;  %s9705_s18 = smov (%p38_p5, %s36_s18), 0 }
  0x3e   : > { %p8183_p13 = por %p9689_p10, %p52_p12  ;;  %p54_p9 = por %p53_p7, %p52_p12 }
  0x3f   : > { %s256_s14 = sand.u32 1, %s8008_s23   ;;  %s40_s20 = ssub.s32 %s8016_s25, %s9705_s18 }
  0x40   : > { %p43_p1 = scmp.eq.s32.totalorder %s40_s20, 0  ;;  %s6930_s16 = sshll.u32 %s256_s14, 7 }
  0x41   : > { %s7058_s27 = sshll.u32 %s8016_s25, 11  ;;  %s260_s15 = scalar_lea.vmem [#allocation2], %s6930_s16 }
  0x42   : > { %s8195_s28 = scalar_select %p43_p1, %s8008_s23, %s45_s17  }
  0x43   : > { %s268_s30 = scalar_lea.hbm %s9666_s0, %s7058_s27  ;;  %s269_s11 = sshll.u32 %s260_s15, 4  ;;  %s270_s11 = int_to_ptr.vmem [resolvable:$true] %s269_s11 }
  0x44   : > { %p8202_p11 = pnand %p7597_p0, %p54_p9  ;;  %s257_s1 = scalar_lea.sflag [#allocation3], %s256_s14 }
  0x45   : > { %s7917_s20 = scalar_lea.vmem %s270_s11, 2048  ;;  %s8027_s17 = smov [#allocation2]  }
  0x46   : > { %p7906_p6 = pneg %p8202_p11  ;;  %p7918_p3 = scmp.ne.s32.totalorder %s270_s11, %s7917_s20 }
  0x47   : > { %s7922_s2 = sshll.u32 %s8027_s17, 4  ;;  %s7923_s2 = int_to_ptr.vmem [resolvable:$false] %s7922_s2 }
  0x48   : > { %p7920_p4 = pnand %p7918_p3, %p7906_p6  ;;  %s7924_s27 = scalar_lea.vmem %s7923_s2, 4096 }
  0x49   : > { %p7925_p8 = scmp.lt.s32.totalorder %s270_s11, %s7923_s2  ;;  %p7926_p12 = scmp.lt.s32.totalorder %s7924_s27, %s7917_s20 }
  0x4a   : > { %p7921_p2 = pneg %p7920_p4 }
  0x4b   : > { %p7927_p5 = por %p7926_p12, %p7925_p8 }
  0x4d   : > { %p7928_p7 = pnand %p7927_p5, %p7921_p2 }
  0x4f   : > { %7931 = shalt.err (!%p7928_p7)
}
  0x50   : > { %s9692_s16 = smov 8   ;;  %s9693_s10 = smov 128  }
  0x51   : > { %7589 = dma.hbm_to_vmem [thread:$0]  (!%p8202_p11), %s268_s30, 2048, %s270_s11, %s257_s1, %s9693_s10, %s9693_s10, %s9692_s16  }
  0x52   : > { %p9694_p10 = scmp.ne.s32.totalorder %s9685_s9, 0 }
  0x53   : > { %s8216_s14 = sand.u32 (!%p9694_p10), 1, %s8004_s22   ;;  %p9695_p0 = scmp.ne.s32.totalorder (!%p9694_p10), %s9683_s7, 0 }
  0x54   : > { %281 = sbr.rel (%p9694_p10) target bundleno = 2107 (0x83b), region = 44  ;;  %s6934_s2 = sshll.u32 (!%p9694_p10), %s8216_s14, 7 }
  0x55   : > { %s284_s13 = scalar_lea.sflag (!%p9694_p10), [#allocation3], %s8216_s14  ;;  %s8222_s15 = scalar_lea.vmem (!%p9694_p10), [#allocation2], %s6934_s2 }
  0x59   : > { %7983 = dma.done.wait (%p9695_p0), %s284_s13, 2048  }
  0x5a   : > { %7985 = vsyncadd (%p9695_p0), %s284_s13, 4294965248  ;;  %p9696_p9 = scmp.ne.s32.totalorder %s9681_s29, 0 }
  0x5c   : > { %7987 = dma.done.wait (%p9696_p9), [#allocation6], 256  }
  0x5d   : > { %7989 = vsyncadd (%p9696_p9), [#allocation6], 4294967040 }
  0x5e   : > { %7991 = dma.done.wait (%p9696_p9), [#allocation9], 512  }
  0x5f   : > { %7993 = vsyncadd (%p9696_p9), [#allocation9], 4294966784  ;;  %vm350_vm0 = vcmask 261120   ;;  %v349_v0 = vld [vmem:[#allocation8 + $0x18] sm:$0xff]  ;;  %v348_v1 = vld [vmem:[#allocation8 + $0x10] sm:$0xff]  ;;  %v550_v22 = vlaneseq  ;;  %vm8030_vm1 = vmmov 0  }
  0x60   : > { %7208 = vmatprep.subr.mxu0 %v349_v0  ;;  %v330_v2 = vld [vmem:[%s8222_s15] sm:$0xff]  ;;  %v347_v3 = vld [vmem:[#allocation8 + $0x8] sm:$0xff]  ;;  %v346_v4 = vld [vmem:[#allocation8] sm:$0xff]  ;;  %v8028_v20 = vmov 1966171168   ;;  %vm1301_vm2 = vcmask 130048  }
  0x61   : > { %7209 = vmatpush3.msra.mxu0 %v349_v0  ;;  %7216 = vmatprep.mubr.msk.f32.mxu0 %vm350_vm0, %v330_v2  ;;  %v8239_v5 = vld [vmem:[%s8222_s15 + $0x8] sm:$0xff]  ;;  %v332_v6 = vld [vmem:[%s8222_s15 + $0x10] sm:$0xff]  ;;  %v8246_v7 = vld [vmem:[%s8222_s15 + $0x18] sm:$0xff]  ;;  %v548_v21 = vunpack.c.l.s4 %v8028_v20  ;;  %v8310_v24 = vshrl.u32 %v550_v22, 7  ;;  %vm2486_vm3 = vcmask 64512   ;;  %s8033_s11 = smov 112  }
  0x62   : > { %7210 = vmatprep.subr.mxu0 %v348_v1  ;;  %v8249_v8 = vld [vmem:[%s8222_s15 + $0x20] sm:$0xff]  ;;  %v8256_v9 = vld [vmem:[%s8222_s15 + $0x28] sm:$0xff]  ;;  %v8259_v10 = vld [vmem:[%s8222_s15 + $0x30] sm:$0xff]  ;;  %s8034_s12 = smov 16   ;;  %s9551_s30 = scalar_lea.vmem [#allocation10], %s6934_s2 }
  0x63   : > { %7211 = vmatpush3.msra.mxu0 %v348_v1  ;;  %v8266_v11 = vld [vmem:[%s8222_s15 + $0x38] sm:$0xff]  ;;  %v8269_v12 = vld [vmem:[%s8222_s15 + $0x40] sm:$0xff]  ;;  %v8276_v13 = vld [vmem:[%s8222_s15 + $0x48] sm:$0xff]  ;;  %v549_v23 = vunpack.c.0.s8 %v548_v21  ;;  %v8314_v32 = vsub.s32 0, %v8310_v24  ;;  %s7059_s20 = sshll.u32 %s8012_s24, 11  ;;  %s6807_s17 = sshll.u32 %s9551_s30, 4  ;;  %s9602_s17 = int_to_ptr.vmem [resolvable:$true] %s6807_s17 }
  0x64   : > { %7212 = vmatprep.subr.mxu0 %v347_v3  ;;  %v8279_v14 = vld [vmem:[%s8222_s15 + $0x50] sm:$0xff]  ;;  %v8286_v15 = vld [vmem:[%s8222_s15 + $0x58] sm:$0xff]  ;;  %v8289_v16 = vld [vmem:[%s8222_s15 + $0x60] sm:$0xff]  ;;  %s9600_s16 = scalar_lea.hbm %s9672_s6, %s7059_s20  ;;  %s6792_s10 = scalar_lea.sflag [#allocation4], %s8216_s14 }
  0x65   : > { %7213 = vmatpush3.msra.mxu0 %v347_v3  ;;  %v8296_v17 = vld [vmem:[%s8222_s15 + $0x68] sm:$0xff]  ;;  %v8299_v18 = vld [vmem:[%s8222_s15 + $0x70] sm:$0xff]  ;;  %v8306_v19 = vld [vmem:[%s8222_s15 + $0x78] sm:$0xff]  ;;  %v552_v25 = vsub.s32 %v549_v23, %v8310_v24  ;;  %s7932_s2 = scalar_lea.vmem %s9602_s17, 2048  ;;  %s8035_s13 = smov [#allocation10]  }
  0x66   : > { %7214 = vmatprep.subr.mxu0 %v346_v4  ;;  %v544_v26 = vld [vmem:[#allocation5] sm:$0xff]  ;;  %v651_v27 = vld [vmem:[#allocation7] sm:$0xff]  ;;  %p7933_p1 = scmp.ne.s32.totalorder %s9602_s17, %s7932_s2  ;;  %s7936_s15 = sshll.u32 %s8035_s13, 4  ;;  %s7937_s15 = int_to_ptr.vmem [resolvable:$false] %s7936_s15 }
  0x67   : > { %7215 = vmatpush3.msra.mxu0 %v346_v4  ;;  %v553_v28 = vrot.slane %v544_v26, %v552_v25  ;;  %v660_v29 = vrot.slane %v651_v27, %v552_v25  ;;  %v546_v42 = vcombine.high %v544_v26, %v544_v26  ;;  %v653_v51 = vcombine.high %v651_v27, %v651_v27  ;;  %s7938_s1 = scalar_lea.vmem %s7937_s15, 4096  ;;  %p7939_p3 = scmp.lt.s32.totalorder %s9602_s17, %s7937_s15 }
  0x68   : > { %7217 = vmatmul.mubr.msk.f32.vlgmr.msra.gmra.mxu0 %vm350_vm0, %v8239_v5  ;;  %p7934_p11 = pnand %p7933_p1, %p8183_p13  ;;  %p7940_p4 = scmp.lt.s32.totalorder %s7938_s1, %s7932_s2 }
  0x69   : > { %7219 = vmatprep.mubr.msk.f32.mxu0 %vm350_vm0, %v332_v6  ;;  %v561_v30 = vcombine.high %v553_v28, %v553_v28  ;;  %v569_v31 = vrot.slane %v553_v28, %v552_v25  ;;  %v668_v33 = vcombine.high %v660_v29, %v660_v29  ;;  %v676_v34 = vrot.slane %v660_v29, %v552_v25 }
  0x6a   : > { %v560_v57 = vrot.slane %v546_v42, %v552_v25  ;;  %v667_v63 = vrot.slane %v653_v51, %v552_v25  ;;  %p7935_p6 = pneg %p7934_p11  ;;  %p7941_p2 = por %p7940_p4, %p7939_p3 }
  0x6b   : > { %v8317_v35 = vrot.slane %v569_v31, %v8314_v32  ;;  %v583_v36 = vrot.slane %v561_v30, %v552_v25  ;;  %v690_v38 = vrot.slane %v668_v33, %v552_v25  ;;  %v8323_v40 = vrot.slane %v676_v34, %v8314_v32 }
  0x6c   : > { %7220 = vmatmul.mubr.msk.f32.gmra.mxu0 %vm350_vm0, %v8246_v7  ;;  %v591_v43 = vcombine.high %v569_v31, %v569_v31  ;;  %v698_v49 = vcombine.high %v676_v34, %v676_v34  ;;  %v576_v4 = vrot.slane %v560_v57, %v552_v25  ;;  %v683_v23 = vrot.slane %v667_v63, %v552_v25  ;;  %p7942_p8 = pnand %p7941_p2, %p7935_p6 }
  0x6d   : > { %7222 = vmatprep.mubr.msk.f32.mxu0 %vm350_vm0, %v8249_v8  ;;  %v635_v39 = vmul.f32 %v8317_v35, %v330_v2  ;;  %v8327_v45 = vrot.slane %v583_v36, %v8314_v32  ;;  %v8332_v47 = vrot.slane %v690_v38, %v8314_v32  ;;  %v593_v53 = vcombine.high %v583_v36, %v583_v36 }
  0x6e   : > { %v8341_v56 = vrot.slane %v591_v43, %v8314_v32  ;;  %v700_v59 = vcombine.high %v690_v38, %v690_v38  ;;  %v8346_v60 = vrot.slane %v698_v49, %v8314_v32  ;;  %v669_v26 = vcombine.high %v667_v63, %v667_v63 }
  0x6f   : > { %v637_v50 = vmul.f32 %v8327_v45, %v332_v6  ;;  %v8353_v1 = vrot.slane %v593_v53, %v8314_v32  ;;  %v562_v6 = vcombine.high %v560_v57, %v560_v57  ;;  %v614_v30 = vrot.slane %v576_v4, %v8314_v32 }
  0x70   : > { %7223 = vmatmul.mubr.msk.f32.gmra.mxu0 %vm350_vm0, %v8256_v9  ;;  %v639_v62 = vmul.f32 %v8341_v56, %v8249_v8  ;;  %v717_v21 = vrot.slane %v700_v59, %v8314_v32  ;;  %v721_v34 = vrot.slane %v683_v23, %v8314_v32  ;;  %v697_v38 = vrot.slane %v669_v26, %v552_v25 }
  0x71   : > { %7225 = vmatprep.mubr.msk.f32.mxu0 %vm350_vm0, %v8259_v10  ;;  %v641_v8 = vmul.f32 %v8353_v1, %v8259_v10  ;;  %v590_v31 = vrot.slane %v562_v6, %v552_v25 }
  0x73   : > { %v618_v43 = vrot.slane %v590_v31, %v8314_v32  ;;  %v594_v57 = vcombine.high %v590_v31, %v590_v31 }
  0x74   : > { %7226 = vmatmul.mubr.msk.f32.gmra.mxu0 %vm350_vm0, %v8266_v11 }
  0x75   : > { %7228 = vmatprep.mubr.msk.f32.mxu0 %vm350_vm0, %v8269_v12  ;;  %v645_v53 = vmul.f32 %v618_v43, %v8279_v14 }
  0x78   : > { %7229 = vmatmul.mubr.msk.f32.gmra.mxu0 %vm350_vm0, %v8276_v13 }
  0x79   : > { %7231 = vmatprep.mubr.msk.f32.mxu0 %vm350_vm0, %v8279_v14  ;;  %v636_v14 = vmul.f32 %v8317_v35, %v8239_v5 }
  0x7c   : > { %7232 = vmatmul.mubr.msk.f32.gmra.mxu0 %vm350_vm0, %v8286_v15 }
  0x7d   : > { %7234 = vmatprep.mubr.msk.f32.mxu0 %vm350_vm0, %v8289_v16 }
  0x80   : > { %7235 = vmatmul.mubr.msk.f32.gmra.mxu0 %vm350_vm0, %v8296_v17 }
  0x81   : > { %7237 = vmatprep.mubr.msk.f32.mxu0 %vm350_vm0, %v8299_v18 }
  0x84   : > { %7238 = vmatmul.mubr.msk.f32.gmra.mxu0 %vm350_vm0, %v8306_v19 }
 0x128   : > { %v8319_v37 = vpop.f32.mrf.mxu0 }
 0x12a   : > { %v465_v41 = vpop.f32.mrf.mxu0 }
 0x12b   : > { %v742_v44 = vmul.f32 %v8323_v40, %v465_v41 }
 0x12c   : > { %v8329_v46 = vpop.f32.mrf.mxu0 }
 0x12d   : > { %v8334_v48 = vadd.f32 %v742_v44, %v635_v39  ;;  %v643_v39 = vmul.f32 %v614_v30, %v8269_v12  ;;  %v592_v44 = vcombine.high %v576_v4, %v576_v4  ;;  %v743_v4 = vmul.f32 %v8319_v37, %v8323_v40 }
 0x12e   : > { %v475_v52 = vpop.f32.mrf.mxu0  ;;  %v745_v5 = vmul.f32 %v8329_v46, %v8332_v47  ;;  %v640_v37 = vmul.f32 %v8341_v56, %v8256_v9  ;;  %v638_v40 = vmul.f32 %v8327_v45, %v8246_v7  ;;  %v644_v9 = vmul.f32 %v614_v30, %v8276_v13 }
 0x12f   : > { %v744_v54 = vmul.f32 %v8332_v47, %v475_v52  ;;  %v774_v55 = vsel %vm350_vm0, %v8334_v48, 0.0  ;;  %v699_v52 = vcombine.high %v683_v23, %v683_v23  ;;  %v642_v7 = vmul.f32 %v8353_v1, %v8266_v11 }
 0x130   : > { %775 = vadd.xlane.f32.xlu0 %v774_v55  ;;  %v8343_v58 = vpop.f32.mrf.mxu0  ;;  %v622_v55 = vrot.slane %v592_v44, %v8314_v32  ;;  %v8409_v47 = vadd.f32 %v745_v5, %v638_v40  ;;  %v646_v11 = vmul.f32 %v618_v43, %v8286_v15 }
 0x131   : > { %v8348_v61 = vadd.f32 %v744_v54, %v637_v50  ;;  %v725_v50 = vrot.slane %v697_v38, %v8314_v32 }
 0x132   : > { %v485_v0 = vpop.f32.mrf.mxu0  ;;  %v648_v13 = vmul.f32 %v622_v55, %v8296_v17 }
 0x133   : > { %v746_v2 = vmul.f32 %v8346_v60, %v485_v0  ;;  %v780_v3 = vsel %vm350_vm0, %v8348_v61, 0.0  ;;  %v701_v0 = vcombine.high %v697_v38, %v697_v38  ;;  %v8405_v38 = vadd.f32 %v743_v4, %v636_v14 }
 0x134   : > { %781 = vadd.xlane.f32.xlu0 %v780_v3  ;;  %v7227_v20 = vpop.f32.mrf.mxu0 }
 0x135   : > { %v8359_v22 = vadd.f32 %v746_v2, %v639_v62  ;;  %v729_v62 = vrot.slane %v699_v52, %v8314_v32  ;;  %v647_v2 = vmul.f32 %v622_v55, %v8289_v16  ;;  %v749_v46 = vmul.f32 %v7227_v20, %v717_v21 }
 0x136   : > { %v495_v27 = vpop.f32.mrf.mxu0  ;;  %v777_v56 = vsel %vm350_vm0, %v8405_v38, 0.0  ;;  %v783_v20 = vsel %vm350_vm0, %v8409_v47, 0.0 }
 0x137   : > { %v748_v28 = vmul.f32 %v717_v21, %v495_v27  ;;  %v786_v29 = vsel %vm350_vm0, %v8359_v22, 0.0  ;;  %v733_v27 = vrot.slane %v701_v0, %v8314_v32  ;;  %v8422_v21 = vadd.f32 %v749_v46, %v642_v7 }
 0x138   : > { %787 = vadd.xlane.f32.xlu1 %v786_v29  ;;  %v7230_v33 = vpop.f32.mrf.mxu0  ;;  %v747_v29 = vmul.f32 %v8343_v58, %v8346_v60 }
 0x139   : > { %v8367_v36 = vadd.f32 %v748_v28, %v641_v8  ;;  %v626_v8 = vrot.slane %v594_v57, %v8314_v32  ;;  %v751_v45 = vmul.f32 %v7230_v33, %v721_v34 }
 0x13a   : > { %v505_v41 = vpop.f32.mrf.mxu0  ;;  %v8418_v60 = vadd.f32 %v747_v29, %v640_v37 }
 0x13b   : > { %v750_v10 = vmul.f32 %v721_v34, %v505_v41  ;;  %v792_v42 = vsel %vm350_vm0, %v8367_v36, 0.0  ;;  %v649_v16 = vmul.f32 %v626_v8, %v8299_v18  ;;  %v8428_v34 = vadd.f32 %v751_v45, %v644_v9 }
 0x13c   : > { %793 = vadd.xlane.f32.xlu1 %v792_v42  ;;  %v7233_v49 = vpop.f32.mrf.mxu0  ;;  %v789_v33 = vsel %vm350_vm0, %v8418_v60, 0.0  ;;  %v650_v41 = vmul.f32 %v626_v8, %v8306_v19 }
 0x13d   : > { %v8374_v51 = vadd.f32 %v750_v10, %v643_v39  ;;  %v753_v1 = vmul.f32 %v7233_v49, %v725_v50  ;;  %v795_v39 = vsel %vm350_vm0, %v8422_v21, 0.0  ;;  %v801_v17 = vsel %vm350_vm0, %v8428_v34, 0.0 }
 0x13e   : > { %v515_v25 = vpop.f32.mrf.mxu0 }
 0x13f   : > { %v752_v54 = vmul.f32 %v725_v50, %v515_v25  ;;  %v798_v12 = vsel %vm350_vm0, %v8374_v51, 0.0  ;;  %v8437_v15 = vadd.f32 %v753_v1, %v646_v11 }
 0x140   : > { %799 = vadd.xlane.f32.xlu0 %v798_v12  ;;  %v7236_v59 = vpop.f32.mrf.mxu0 }
 0x141   : > { %v8381_v63 = vadd.f32 %v752_v54, %v645_v53  ;;  %v755_v30 = vmul.f32 %v7236_v59, %v729_v62  ;;  %v807_v44 = vsel %vm350_vm0, %v8437_v15, 0.0 }
 0x142   : > { %v525_v3 = vpop.f32.mrf.mxu0 }
 0x143   : > { %v754_v6 = vmul.f32 %v729_v62, %v525_v3  ;;  %v804_v23 = vsel %vm350_vm0, %v8381_v63, 0.0  ;;  %v8435_v42 = vadd.f32 %v755_v30, %v648_v13 }
 0x144   : > { %805 = vadd.xlane.f32.xlu1 %v804_v23  ;;  %v7239_v26 = vpop.f32.mrf.mxu0 }
 0x145   : > { %v8392_v28 = vadd.f32 %v754_v6, %v647_v2  ;;  %v757_v10 = vmul.f32 %v7239_v26, %v733_v27  ;;  %v813_v43 = vsel %vm350_vm0, %v8435_v42, 0.0 }
 0x146   : > { %v535_v35 = vpop.f32.mrf.mxu0 }
 0x147   : > { %v756_v31 = vmul.f32 %v733_v27, %v535_v35  ;;  %v810_v32 = vsel %vm350_vm0, %v8392_v28, 0.0  ;;  %v8443_v49 = vadd.f32 %v757_v10, %v650_v41 }
 0x148   : > { %811 = vadd.xlane.f32.xlu0 %v810_v32 }
 0x149   : > { %v8407_v18 = vadd.f32 %v756_v31, %v649_v16  ;;  %v819_v19 = vsel %vm350_vm0, %v8443_v49, 0.0 }
 0x14b   : > { %v816_v58 = vsel %vm350_vm0, %v8407_v18, 0.0 }
 0x14c   : > { %778 = vadd.xlane.f32.xlu0 %v777_v56  ;;  %817 = vadd.xlane.f32.xlu1 %v816_v58 }
 0x150   : > { %790 = vadd.xlane.f32.xlu0 %v789_v33  ;;  %784 = vadd.xlane.f32.xlu1 %v783_v20 }
 0x154   : > { %802 = vadd.xlane.f32.xlu0 %v801_v17  ;;  %796 = vadd.xlane.f32.xlu1 %v795_v39 }
 0x158   : > { %814 = vadd.xlane.f32.xlu0 %v813_v43  ;;  %808 = vadd.xlane.f32.xlu1 %v807_v44 }
 0x15c   : > { %820 = vadd.xlane.f32.xlu1 %v819_v19 }
 0x1b9   : > { %v776_v50 = vpop.xlane.xlu0 %775 }
 0x1ba   : > { %v823_v52 = vmul.f32 0.03125, %v776_v50 }
 0x1bc   : > { %v8448_v53 = vsub.f32 %v8334_v48, %v823_v52 }
 0x1bd   : > { %v782_v25 = vpop.xlane.xlu0 %781 }
 0x1be   : > { %v825_v54 = vmul.f32 0.03125, %v782_v25  ;;  %v855_v12 = vmul.f32 %v8448_v53, %v8448_v53 }
 0x1c0   : > { %v8453_v55 = vsub.f32 %v8348_v61, %v825_v54  ;;  %v871_v57 = vsel %vm350_vm0, %v855_v12, 0.0 }
 0x1c1   : > { %v788_v59 = vpop.xlane.xlu1 %787  ;;  %872 = vadd.xlane.f32.xlu0 %v871_v57 }
 0x1c2   : > { %v827_v62 = vmul.f32 0.03125, %v788_v59  ;;  %v857_v0 = vmul.f32 %v8453_v55, %v8453_v55 }
 0x1c4   : > { %v8459_v2 = vsub.f32 %v8359_v22, %v827_v62  ;;  %v877_v48 = vsel %vm350_vm0, %v857_v0, 0.0 }
 0x1c5   : > { %v794_v3 = vpop.xlane.xlu1 %793  ;;  %878 = vadd.xlane.f32.xlu1 %v877_v48 }
 0x1c6   : > { %v829_v14 = vmul.f32 0.03125, %v794_v3  ;;  %v859_v61 = vmul.f32 %v8459_v2, %v8459_v2 }
 0x1c8   : > { %v8465_v4 = vsub.f32 %v8367_v36, %v829_v14  ;;  %v883_v6 = vsel %vm350_vm0, %v859_v61, 0.0 }
 0x1c9   : > { %v800_v23 = vpop.xlane.xlu0 %799  ;;  %884 = vadd.xlane.f32.xlu0 %v883_v6 }
 0x1ca   : > { %v831_v8 = vmul.f32 0.03125, %v800_v23  ;;  %v861_v22 = vmul.f32 %v8465_v4, %v8465_v4 }
 0x1cc   : > { %v8471_v26 = vsub.f32 %v8374_v51, %v831_v8  ;;  %v889_v27 = vsel %vm350_vm0, %v861_v22, 0.0 }
 0x1cd   : > { %v806_v16 = vpop.xlane.xlu1 %805  ;;  %890 = vadd.xlane.f32.xlu1 %v889_v27 }
 0x1ce   : > { %v833_v5 = vmul.f32 0.03125, %v806_v16  ;;  %v863_v36 = vmul.f32 %v8471_v26, %v8471_v26  ;;  %v8029_v16 = vmov 0.0  }
 0x1cf   : > { %7240 = vmatprep.subr.mxu1 %v8029_v16  ;;  %7285 = vmatprep.subr.mxu0 %v8029_v16 }
 0x1d0   : > { %v8477_v35 = vsub.f32 %v8381_v63, %v833_v5  ;;  %v895_v37 = vsel %vm350_vm0, %v863_v36, 0.0  ;;  %7242 = vmatprep.mubr.msk.f32.mxu1 %vm8030_vm1, %v8029_v16  ;;  %7287 = vmatprep.mubr.msk.f32.mxu0 %vm8030_vm1, %v8029_v16 }
 0x1d1   : > { %896 = vadd.xlane.f32.xlu0 %v895_v37  ;;  %v812_v40 = vpop.xlane.xlu0 %811 }
 0x1d2   : > { %v835_v29 = vmul.f32 0.03125, %v812_v40  ;;  %v865_v51 = vmul.f32 %v8477_v35, %v8477_v35 }
 0x1d4   : > { %v8483_v31 = vsub.f32 %v8392_v28, %v835_v29  ;;  %v901_v32 = vsel %vm350_vm0, %v865_v51, 0.0 }
 0x1d5   : > { %v779_v46 = vpop.xlane.xlu0 %778  ;;  %902 = vadd.xlane.f32.xlu1 %v901_v32  ;;  %v818_v9 = vpop.xlane.xlu1 %817 }
 0x1d6   : > { %v824_v7 = vmul.f32 0.03125, %v779_v46  ;;  %v837_v45 = vmul.f32 0.03125, %v818_v9  ;;  %v867_v63 = vmul.f32 %v8483_v31, %v8483_v31 }
 0x1d8   : > { %v8489_v56 = vsub.f32 %v8405_v38, %v824_v7  ;;  %v8492_v58 = vsub.f32 %v8407_v18, %v837_v45  ;;  %v907_v20 = vsel %vm350_vm0, %v867_v63, 0.0 }
 0x1d9   : > { %908 = vadd.xlane.f32.xlu0 %v907_v20  ;;  %v791_v28 = vpop.xlane.xlu0 %790  ;;  %v785_v13 = vpop.xlane.xlu1 %784 }
 0x1da   : > { %v828_v11 = vmul.f32 0.03125, %v791_v28  ;;  %v826_v1 = vmul.f32 0.03125, %v785_v13  ;;  %v856_v30 = vmul.f32 %v8489_v56, %v8489_v56  ;;  %v869_v33 = vmul.f32 %v8492_v58, %v8492_v58 }
 0x1dc   : > { %v8500_v39 = vsub.f32 %v8418_v60, %v828_v11  ;;  %v8503_v38 = vsub.f32 %v8409_v47, %v826_v1  ;;  %v874_v18 = vsel %vm350_vm0, %v856_v30, 0.0  ;;  %v913_v41 = vsel %vm350_vm0, %v869_v33, 0.0 }
 0x1dd   : > { %875 = vadd.xlane.f32.xlu0 %v874_v18  ;;  %v803_v10 = vpop.xlane.xlu0 %802  ;;  %914 = vadd.xlane.f32.xlu1 %v913_v41  ;;  %v797_v17 = vpop.xlane.xlu1 %796 }
 0x1de   : > { %v832_v43 = vmul.f32 0.03125, %v803_v10  ;;  %v830_v44 = vmul.f32 0.03125, %v797_v17  ;;  %v860_v19 = vmul.f32 %v8500_v39, %v8500_v39  ;;  %v858_v60 = vmul.f32 %v8503_v38, %v8503_v38 }
 0x1e0   : > { %v8512_v50 = vsub.f32 %v8428_v34, %v832_v43  ;;  %v8515_v47 = vsub.f32 %v8422_v21, %v830_v44  ;;  %v886_v52 = vsel %vm350_vm0, %v860_v19, 0.0  ;;  %v880_v25 = vsel %vm350_vm0, %v858_v60, 0.0 }
 0x1e1   : > { %887 = vadd.xlane.f32.xlu0 %v886_v52  ;;  %v815_v54 = vpop.xlane.xlu0 %814  ;;  %881 = vadd.xlane.f32.xlu1 %v880_v25  ;;  %v809_v12 = vpop.xlane.xlu1 %808 }
 0x1e2   : > { %v836_v57 = vmul.f32 0.03125, %v815_v54  ;;  %v834_v59 = vmul.f32 0.03125, %v809_v12  ;;  %v864_v62 = vmul.f32 %v8512_v50, %v8512_v50  ;;  %v862_v34 = vmul.f32 %v8515_v47, %v8515_v47 }
 0x1e4   : > { %v8524_v0 = vsub.f32 %v8435_v42, %v836_v57  ;;  %v8527_v21 = vsub.f32 %v8437_v15, %v834_v59  ;;  %v898_v48 = vsel %vm350_vm0, %v864_v62, 0.0  ;;  %v892_v3 = vsel %vm350_vm0, %v862_v34, 0.0 }
 0x1e5   : > { %899 = vadd.xlane.f32.xlu0 %v898_v48  ;;  %893 = vadd.xlane.f32.xlu1 %v892_v3  ;;  %v821_v14 = vpop.xlane.xlu1 %820 }
 0x1e6   : > { %v838_v61 = vmul.f32 0.03125, %v821_v14  ;;  %v868_v6 = vmul.f32 %v8524_v0, %v8524_v0  ;;  %v866_v23 = vmul.f32 %v8527_v21, %v8527_v21 }
 0x1e8   : > { %v8536_v42 = vsub.f32 %v8443_v49, %v838_v61  ;;  %v910_v15 = vsel %vm350_vm0, %v868_v6, 0.0  ;;  %v904_v8 = vsel %vm350_vm0, %v866_v23, 0.0 }
 0x1e9   : > { %911 = vadd.xlane.f32.xlu0 %v910_v15  ;;  %905 = vadd.xlane.f32.xlu1 %v904_v8 }
 0x1ea   : > { %v870_v22 = vmul.f32 %v8536_v42, %v8536_v42 }
 0x1ec   : > { %v916_v27 = vsel %vm350_vm0, %v870_v22, 0.0 }
 0x1ed   : > { %917 = vadd.xlane.f32.xlu1 %v916_v27  ;;  %v8555_v27 = vld [vmem:[%s9670_s4] ss:$0 sm:$0xff] }
 0x24a   : > { %v873_v49 = vpop.xlane.xlu0 %872 }
 0x24b   : > { %v919_v32 = vmul.f32 0.03125, %v873_v49 }
 0x24d   : > { %v935_v20 = vadd.f32 1e-05, %v919_v32 }
 0x24e   : > { %v879_v5 = vpop.xlane.xlu1 %878 }
 0x24f   : > { %v921_v40 = vmul.f32 0.03125, %v879_v5 }
 0x251   : > { %v937_v7 = vadd.f32 1e-05, %v921_v40 }
 0x252   : > { %v885_v36 = vpop.xlane.xlu0 %884 }
 0x253   : > { %v923_v51 = vmul.f32 0.03125, %v885_v36 }
 0x255   : > { %v939_v45 = vadd.f32 1e-05, %v923_v51 }
 0x256   : > { %v891_v37 = vpop.xlane.xlu1 %890 }
 0x257   : > { %v925_v29 = vmul.f32 0.03125, %v891_v37 }
 0x259   : > { %v941_v46 = vadd.f32 1e-05, %v925_v29 }
 0x25a   : > { %v897_v9 = vpop.xlane.xlu0 %896 }
 0x25b   : > { %v927_v63 = vmul.f32 0.03125, %v897_v9  ;;  %7666 = vrsqrt.f32 %v941_v46 }
 0x25c   : > { %7668 = vrsqrt.f32 %v937_v7 }
 0x25d   : > { %7670 = vrsqrt.f32 %v939_v45  ;;  %v943_v11 = vadd.f32 1e-05, %v927_v63 }
 0x25e   : > { %v903_v28 = vpop.xlane.xlu1 %902  ;;  %7672 = vrsqrt.f32 %v935_v20  ;;  %v8567_v20 = vld [vmem:[%s9671_s5] ss:$0 sm:$0xff] }
 0x25f   : > { %v929_v13 = vmul.f32 0.03125, %v903_v28  ;;  %7674 = vrsqrt.f32 %v943_v11 }
 0x261   : > { %v945_v1 = vadd.f32 1e-05, %v929_v13 }
 0x262   : > { %v909_v30 = vpop.xlane.xlu0 %908 }
 0x263   : > { %v931_v33 = vmul.f32 0.03125, %v909_v30  ;;  %7676 = vrsqrt.f32 %v945_v1 }
 0x265   : > { %v947_v18 = vadd.f32 1e-05, %v931_v33 }
 0x266   : > { %v876_v41 = vpop.xlane.xlu0 %875  ;;  %v915_v10 = vpop.xlane.xlu1 %914 }
 0x267   : > { %7678 = vrsqrt.f32 %v947_v18  ;;  %v933_v17 = vmul.f32 0.03125, %v915_v10  ;;  %v920_v43 = vmul.f32 0.03125, %v876_v41 }
 0x268   : > { %v7667_v52 = vpop.eup %7666 }
 0x269   : > { %v949_v44 = vadd.f32 1e-05, %v933_v17  ;;  %v7669_v12 = vpop.eup %7668  ;;  %v936_v59 = vadd.f32 1e-05, %v920_v43  ;;  %v973_v3 = vmul.f32 %v7667_v52, %v8465_v4 }
 0x26a   : > { %v888_v19 = vpop.xlane.xlu0 %887  ;;  %v882_v60 = vpop.xlane.xlu1 %881  ;;  %v969_v15 = vmul.f32 %v7669_v12, %v8453_v55  ;;  %v8031_v55 = vmov 1983009808  }
 0x26b   : > { %v924_v25 = vmul.f32 0.03125, %v888_v19  ;;  %v922_v54 = vmul.f32 0.03125, %v882_v60  ;;  %7680 = vrsqrt.f32 %v949_v44  ;;  %v7671_v57 = vpop.eup %7670  ;;  %v996_v36 = vmul.f32 %v8555_v27, %v973_v3 }
 0x26c   : > { %v7673_v48 = vpop.eup %7672  ;;  %v971_v8 = vmul.f32 %v7671_v57, %v8459_v2  ;;  %v1032_v51 = vunpack.c.l.s4 %v8031_v55  ;;  %v992_v9 = vmul.f32 %v8555_v27, %v969_v15 }
 0x26d   : > { %v940_v62 = vadd.f32 1e-05, %v924_v25  ;;  %v938_v34 = vadd.f32 1e-05, %v922_v54  ;;  %v7675_v22 = vpop.eup %7674  ;;  %v967_v49 = vmul.f32 %v7673_v48, %v8448_v53  ;;  %v8571_v30 = vadd.f32 %v8567_v20, %v996_v36 }
 0x26e   : > { %v900_v14 = vpop.xlane.xlu0 %899  ;;  %v894_v61 = vpop.xlane.xlu1 %893  ;;  %v994_v7 = vmul.f32 %v8555_v27, %v971_v8  ;;  %v975_v53 = vmul.f32 %v7675_v22, %v8471_v26  ;;  %v1033_v33 = vunpack.c.0.s8 %v1032_v51  ;;  %v8576_v41 = vadd.f32 %v8567_v20, %v992_v9 }
 0x26f   : > { %7682 = vrsqrt.f32 %v940_v62  ;;  %v928_v6 = vmul.f32 0.03125, %v900_v14  ;;  %v926_v23 = vmul.f32 0.03125, %v894_v61  ;;  %v990_v45 = vmul.f32 %v8555_v27, %v967_v49 }
 0x270   : > { %7684 = vrsqrt.f32 %v938_v34  ;;  %v7677_v29 = vpop.eup %7676  ;;  %v8579_v10 = vadd.f32 %v8567_v20, %v994_v7  ;;  %v1045_v54 = vcombine.low %v8576_v41, %v8571_v30  ;;  %v8592_v57 = vsub.s32 %v1033_v33, %v8310_v24 }
 0x271   : > { %7686 = vrsqrt.f32 %v936_v59  ;;  %v944_v4 = vadd.f32 1e-05, %v928_v6  ;;  %v942_v5 = vadd.f32 1e-05, %v926_v23  ;;  %v977_v11 = vmul.f32 %v7677_v29, %v8477_v35 }
 0x272   : > { %v912_v37 = vpop.xlane.xlu0 %911  ;;  %v906_v40 = vpop.xlane.xlu1 %905  ;;  %v8032_v35 = vmov 1934713408   ;;  %v8582_v19 = vadd.f32 %v8567_v20, %v990_v45  ;;  %v1053_v6 = vrot.slane %v1045_v54, %v8592_v57 }
 0x273   : > { %7688 = vrsqrt.f32 %v944_v4  ;;  %v932_v2 = vmul.f32 0.03125, %v912_v37  ;;  %v930_v32 = vmul.f32 0.03125, %v906_v40  ;;  %v1096_v43 = vunpack.c.l.s4 %v8032_v35 }
 0x274   : > { %v7679_v46 = vpop.eup %7678  ;;  %7690 = vrsqrt.f32 %v942_v5  ;;  %v1000_v60 = vmul.f32 %v8555_v27, %v977_v11  ;;  %v1029_v34 = vcombine.low %v8582_v19, %v8579_v10  ;;  %v1046_v35 = vcombine.high %v8576_v41, %v8571_v30 }
 0x275   : > { %v979_v63 = vmul.f32 %v7679_v46, %v8483_v31  ;;  %v948_v28 = vadd.f32 1e-05, %v932_v2  ;;  %v946_v13 = vadd.f32 1e-05, %v930_v32  ;;  %v998_v31 = vmul.f32 %v8555_v27, %v975_v53 }
 0x276   : > { %v918_v1 = vpop.xlane.xlu1 %917  ;;  %v1097_v48 = vunpack.c.0.s8 %v1096_v43  ;;  %v1023_v14 = vadd.f32 %v8567_v20, %v1000_v60  ;;  %v1037_v49 = vrot.slane %v1029_v34, %v8592_v57  ;;  %v1030_v30 = vcombine.high %v8582_v19, %v8579_v10 }
 0x277   : > { %v1002_v26 = vmul.f32 %v8555_v27, %v979_v63  ;;  %7692 = vrsqrt.f32 %v948_v28  ;;  %v934_v18 = vmul.f32 0.03125, %v918_v1  ;;  %v8596_v62 = vadd.f32 %v8567_v20, %v998_v31 }
 0x278   : > { %7694 = vrsqrt.f32 %v946_v13  ;;  %v7681_v17 = vpop.eup %7680  ;;  %v8609_v36 = vsub.s32 %v1097_v48, %v8310_v24  ;;  %v1093_v51 = vcombine.low %v1037_v49, %v1053_v6  ;;  %v8672_v19 = vrot.slane %v1046_v35, %v8592_v57 }
 0x279   : > { %v950_v44 = vadd.f32 1e-05, %v934_v18  ;;  %v981_v52 = vmul.f32 %v7681_v17, %v8492_v58  ;;  %v8587_v25 = vadd.f32 %v8567_v20, %v1002_v26 }
 0x27a   : > { %v1101_v45 = vrot.slane %v1093_v51, %v8609_v36 }
 0x27b   : > { %7696 = vrsqrt.f32 %v950_v44  ;;  %v1004_v59 = vmul.f32 %v8555_v27, %v981_v52  ;;  %v1061_v23 = vcombine.low %v8596_v62, %v8587_v25  ;;  %v1062_v43 = vcombine.high %v8596_v62, %v8587_v25 }
 0x27c   : > { %v7683_v12 = vpop.eup %7682  ;;  %v1094_v44 = vcombine.high %v1037_v49, %v1053_v6 }
 0x27d   : > { %v7685_v58 = vpop.eup %7684  ;;  %v1027_v61 = vadd.f32 %v8567_v20, %v1004_v59  ;;  %v972_v15 = vmul.f32 %v7683_v12, %v8500_v39  ;;  %v1069_v29 = vrot.slane %v1061_v23, %v8592_v57 }
 0x27e   : > { %v7687_v3 = vpop.eup %7686  ;;  %v970_v22 = vmul.f32 %v7685_v58, %v8503_v38  ;;  %v1108_v10 = vrot.slane %v1094_v44, %v8609_v36  ;;  %v1076_v58 = vrot.slane %v1062_v43, %v8592_v57 }
 0x27f   : > { %v1077_v4 = vcombine.low %v1023_v14, %v1027_v61  ;;  %v968_v37 = vmul.f32 %v7687_v3, %v8489_v56  ;;  %v995_v39 = vmul.f32 %v8555_v27, %v972_v15  ;;  %v1078_v1 = vcombine.high %v1023_v14, %v1027_v61 }
 0x280   : > { %v7689_v8 = vpop.eup %7688  ;;  %v993_v32 = vmul.f32 %v8555_v27, %v970_v22  ;;  %v1044_v61 = vrot.slane %v1030_v30, %v8592_v57 }
 0x281   : > { %v7691_v5 = vpop.eup %7690  ;;  %v1085_v55 = vrot.slane %v1077_v4, %v8592_v57  ;;  %v976_v38 = vmul.f32 %v7689_v8, %v8512_v50  ;;  %v991_v56 = vmul.f32 %v8555_v27, %v968_v37  ;;  %v8628_v63 = vadd.f32 %v8567_v20, %v995_v39 }
 0x282   : > { %v974_v40 = vmul.f32 %v7691_v5, %v8515_v47  ;;  %v8659_v12 = vrot.slane %v1078_v1, %v8592_v57  ;;  %v1109_v4 = vcombine.low %v1044_v61, %v8672_v19 }
 0x283   : > { %v1125_v24 = vcombine.low %v1069_v29, %v1085_v55  ;;  %v999_v28 = vmul.f32 %v8555_v27, %v976_v38  ;;  %v1126_v33 = vcombine.high %v1069_v29, %v1085_v55 }
 0x284   : > { %v7693_v2 = vpop.eup %7692  ;;  %v997_v46 = vmul.f32 %v8555_v27, %v974_v40  ;;  %v1141_v6 = vcombine.low %v1076_v58, %v8659_v12 }
 0x285   : > { %v7695_v9 = vpop.eup %7694  ;;  %v980_v47 = vmul.f32 %v7693_v2, %v8524_v0  ;;  %v1133_v50 = vrot.slane %v1125_v24, %v8609_v36  ;;  %v1016_v0 = vadd.f32 %v8567_v20, %v993_v32  ;;  %v1022_v52 = vadd.f32 %v8567_v20, %v999_v28 }
 0x286   : > { %v8622_v7 = vadd.f32 %v8567_v20, %v997_v46  ;;  %v978_v53 = vmul.f32 %v7695_v9, %v8527_v21  ;;  %v8636_v21 = vadd.f32 %v8567_v20, %v991_v56  ;;  %v1140_v25 = vrot.slane %v1126_v33, %v8609_v36 }
 0x287   : > { %v1003_v13 = vmul.f32 %v8555_v27, %v980_v47  ;;  %v8633_v26 = vcombine.low %v1101_v45, %v1133_v50  ;;  %v8655_v41 = vcombine.high %v1101_v45, %v1133_v50  ;;  %v1149_v51 = vrot.slane %v1141_v6, %v8609_v36 }
 0x288   : > { %v7697_v11 = vpop.eup %7696  ;;  %v1001_v31 = vmul.f32 %v8555_v27, %v978_v53  ;;  %v1181_v60 = vcombine.low %v1016_v0, %v8622_v7  ;;  %v8677_v14 = vcombine.low %v1108_v10, %v1140_v25  ;;  %v1182_v23 = vcombine.high %v1016_v0, %v8622_v7 }
 0x289   : > { %v1026_v18 = vadd.f32 %v8567_v20, %v1003_v13  ;;  %v982_v17 = vmul.f32 %v7697_v11, %v8536_v42  ;;  %7241 = vmatpush3.xpose.msk.msra.mxu1 %vm1301_vm2, %v8633_v26  ;;  %v1165_v42 = vcombine.low %v8636_v21, %v8628_v63  ;;  %v1166_v40 = vcombine.high %v8636_v21, %v8628_v63 }
 0x28a   : > { %7245 = vmatprep.subr.mxu1 %v8029_v16  ;;  %v1024_v59 = vadd.f32 %v8567_v20, %v1001_v31  ;;  %v8695_v55 = vcombine.high %v1108_v10, %v1140_v25  ;;  %v1196_v39 = vrot.slane %v1182_v23, %v8592_v57  ;;  %v1117_v24 = vrot.slane %v1109_v4, %v8609_v36 }
 0x28b   : > { %v1005_v54 = vmul.f32 %v8555_v27, %v982_v17  ;;  %v1189_v27 = vrot.slane %v1181_v60, %v8592_v57  ;;  %v1197_v34 = vcombine.low %v1022_v52, %v1026_v18  ;;  %v1198_v49 = vcombine.high %v1022_v52, %v1026_v18 }
 0x28c   : > { %7243 = vmatmul.mubr.msk.f32.vlgmr.msra.gmra.mxu1 %vm1301_vm2, %v8633_v26  ;;  %v1180_v47 = vrot.slane %v1166_v40, %v8592_v57  ;;  %v8714_v53 = vcombine.low %v1117_v24, %v1149_v51  ;;  %v1142_v45 = vcombine.high %v1076_v58, %v8659_v12  ;;  %v1110_v28 = vcombine.high %v1044_v61, %v8672_v19 }
 0x28d   : > { %v1028_v62 = vadd.f32 %v8567_v20, %v1005_v54  ;;  %7246 = vmatpush3.xpose.msk.msra.mxu1 %vm1301_vm2, %v8655_v41  ;;  %7247 = vmatprep.mubr.msk.f32.mxu1 %vm8030_vm1, %v8029_v16  ;;  %v1173_v20 = vrot.slane %v1165_v42, %v8592_v57  ;;  %v1205_v15 = vrot.slane %v1197_v34, %v8592_v57 }
 0x28e   : > { %7250 = vmatprep.subr.mxu1 %v8029_v16  ;;  %v1212_v46 = vrot.slane %v1198_v49, %v8592_v57  ;;  %v1245_v63 = vcombine.low %v1180_v47, %v1196_v39  ;;  %v8734_v1 = vcombine.high %v1117_v24, %v1149_v51  ;;  %v1156_v33 = vrot.slane %v1142_v45, %v8609_v36 }
 0x28f   : > { %v1213_v48 = vcombine.low %v1024_v59, %v1028_v62  ;;  %v1214_v3 = vcombine.high %v1024_v59, %v1028_v62  ;;  %v1229_v22 = vcombine.low %v1173_v20, %v1189_v27  ;;  %v1230_v32 = vcombine.high %v1173_v20, %v1189_v27 }
 0x290   : > { %7248 = vmatmul.mubr.msk.f32.vlgmr.msra.gmra.mxu1 %vm1301_vm2, %v8655_v41  ;;  %v1253_v21 = vrot.slane %v1245_v63, %v8609_v36  ;;  %v1246_v18 = vcombine.high %v1180_v47, %v1196_v39  ;;  %v1124_v31 = vrot.slane %v1110_v28, %v8609_v36 }
 0x291   : > { %v1221_v8 = vrot.slane %v1213_v48, %v8592_v57  ;;  %7251 = vmatpush3.xpose.msk.msra.mxu1 %vm1301_vm2, %v8677_v14  ;;  %7252 = vmatprep.mubr.msk.f32.mxu1 %vm8030_vm1, %v8029_v16  ;;  %v1228_v29 = vrot.slane %v1214_v3, %v8592_v57  ;;  %v1237_v38 = vrot.slane %v1229_v22, %v8609_v36 }
 0x292   : > { %7255 = vmatprep.subr.mxu1 %v8029_v16  ;;  %v1244_v50 = vrot.slane %v1230_v32, %v8609_v36  ;;  %v8756_v43 = vcombine.low %v1124_v31, %v1156_v33  ;;  %v1260_v44 = vrot.slane %v1246_v18, %v8609_v36  ;;  %v8775_v52 = vcombine.high %v1124_v31, %v1156_v33 }
 0x293   : > { %v1261_v5 = vcombine.low %v1205_v15, %v1221_v8  ;;  %v1262_v37 = vcombine.high %v1205_v15, %v1221_v8  ;;  %v1277_v7 = vcombine.low %v1212_v46, %v1228_v29  ;;  %v1278_v0 = vcombine.high %v1212_v46, %v1228_v29 }
 0x294   : > { %7253 = vmatmul.mubr.msk.f32.vlgmr.msra.gmra.mxu1 %vm1301_vm2, %v8677_v14 }
 0x295   : > { %v1269_v2 = vrot.slane %v1261_v5, %v8609_v36  ;;  %7256 = vmatpush3.xpose.msk.msra.mxu1 %vm1301_vm2, %v8695_v55  ;;  %7257 = vmatprep.mubr.msk.f32.mxu1 %vm8030_vm1, %v8029_v16  ;;  %v1276_v56 = vrot.slane %v1262_v37, %v8609_v36  ;;  %v1285_v11 = vrot.slane %v1277_v7, %v8609_v36 }
 0x296   : > { %7260 = vmatprep.subr.mxu1 %v8029_v16  ;;  %v1292_v35 = vrot.slane %v1278_v0, %v8609_v36 }
 0x297   : > { %v8710_v9 = vcombine.high %v1237_v38, %v1269_v2  ;;  %v8729_v13 = vcombine.high %v1244_v50, %v1276_v56  ;;  %v8750_v17 = vcombine.high %v1253_v21, %v1285_v11  ;;  %v8791_v54 = vcombine.low %v1237_v38, %v1269_v2 }
 0x298   : > { %7258 = vmatmul.mubr.msk.f32.vlgmr.msra.gmra.mxu1 %vm1301_vm2, %v8695_v55  ;;  %v8770_v60 = vcombine.high %v1260_v44, %v1292_v35  ;;  %v8803_v42 = vcombine.low %v1244_v50, %v1276_v56  ;;  %v8813_v30 = vcombine.low %v1253_v21, %v1285_v11  ;;  %v8822_v25 = vcombine.low %v1260_v44, %v1292_v35 }
 0x299   : > { %7286 = vmatpush3.xpose.msk.msra.mxu0 %vm1301_vm2, %v8710_v9  ;;  %7261 = vmatpush3.xpose.msk.msra.mxu1 %vm1301_vm2, %v8714_v53 }
 0x29a   : > { %7262 = vmatprep.mubr.msk.f32.mxu1 %vm8030_vm1, %v8029_v16  ;;  %7265 = vmatprep.subr.mxu1 %v8029_v16 }
 0x29b   : > { %7295 = vmatprep.subr.mxu0 %v8029_v16 }
 0x29c   : > { %7288 = vmatmul.mubr.msk.f32.vlgmr.msra.gmra.mxu0 %vm1301_vm2, %v8710_v9  ;;  %7263 = vmatmul.mubr.msk.f32.vlgmr.msra.gmra.mxu1 %vm1301_vm2, %v8714_v53 }
 0x29d   : > { %7296 = vmatpush3.xpose.msk.msra.mxu0 %vm1301_vm2, %v8729_v13  ;;  %7266 = vmatpush3.xpose.msk.msra.mxu1 %vm1301_vm2, %v8734_v1 }
 0x29e   : > { %7267 = vmatprep.mubr.msk.f32.mxu1 %vm8030_vm1, %v8029_v16  ;;  %7297 = vmatprep.mubr.msk.f32.mxu0 %vm8030_vm1, %v8029_v16 }
 0x29f   : > { %7270 = vmatprep.subr.mxu1 %v8029_v16  ;;  %7305 = vmatprep.subr.mxu0 %v8029_v16 }
 0x2a0   : > { %7298 = vmatmul.mubr.msk.f32.vlgmr.msra.gmra.mxu0 %vm1301_vm2, %v8729_v13  ;;  %7268 = vmatmul.mubr.msk.f32.vlgmr.msra.gmra.mxu1 %vm1301_vm2, %v8734_v1 }
 0x2a1   : > { %7306 = vmatpush3.xpose.msk.msra.mxu0 %vm1301_vm2, %v8750_v17  ;;  %7271 = vmatpush3.xpose.msk.msra.mxu1 %vm1301_vm2, %v8756_v43 }
 0x2a2   : > { %7272 = vmatprep.mubr.msk.f32.mxu1 %vm8030_vm1, %v8029_v16  ;;  %7307 = vmatprep.mubr.msk.f32.mxu0 %vm8030_vm1, %v8029_v16 }
 0x2a3   : > { %7275 = vmatprep.subr.mxu1 %v8029_v16  ;;  %7315 = vmatprep.subr.mxu0 %v8029_v16 }
 0x2a4   : > { %7308 = vmatmul.mubr.msk.f32.vlgmr.msra.gmra.mxu0 %vm1301_vm2, %v8750_v17  ;;  %7273 = vmatmul.mubr.msk.f32.vlgmr.msra.gmra.mxu1 %vm1301_vm2, %v8756_v43 }
 0x2a5   : > { %7316 = vmatpush3.xpose.msk.msra.mxu0 %vm1301_vm2, %v8770_v60  ;;  %7276 = vmatpush3.xpose.msk.msra.mxu1 %vm1301_vm2, %v8775_v52 }
 0x2a6   : > { %7277 = vmatprep.mubr.msk.f32.mxu1 %vm8030_vm1, %v8029_v16  ;;  %7317 = vmatprep.mubr.msk.f32.mxu0 %vm8030_vm1, %v8029_v16 }
 0x2a7   : > { %7280 = vmatprep.subr.mxu1 %v8029_v16  ;;  %7325 = vmatprep.subr.mxu0 %v8029_v16 }
 0x2a8   : > { %7318 = vmatmul.mubr.msk.f32.vlgmr.msra.gmra.mxu0 %vm1301_vm2, %v8770_v60  ;;  %7278 = vmatmul.mubr.msk.f32.vlgmr.msra.gmra.mxu1 %vm1301_vm2, %v8775_v52 }
 0x2a9   : > { %7326 = vmatpush3.msra.mxu0 %v8655_v41  ;;  %7281 = vmatpush3.xpose.msk.msra.mxu1 %vm1301_vm2, %v8791_v54 }
 0x2aa   : > { %7282 = vmatprep.mubr.msk.f32.mxu1 %vm8030_vm1, %v8029_v16  ;;  %7290 = vmatprep.subr.mxu1 %v8029_v16 }
 0x2ab   : > { %7327 = vmatprep.mubr.msk.f32.mxu0 %vm8030_vm1, %v8029_v16  ;;  %7335 = vmatprep.subr.mxu0 %v8029_v16 }
 0x2ac   : > { %7283 = vmatmul.mubr.msk.f32.vlgmr.msra.gmra.mxu1 %vm1301_vm2, %v8791_v54 }
 0x2ad   : > { %7291 = vmatpush3.xpose.msk.msra.mxu1 %vm1301_vm2, %v8803_v42  ;;  %7292 = vmatprep.mubr.msk.f32.mxu1 %vm8030_vm1, %v8029_v16 }
 0x2ae   : > { %7300 = vmatprep.subr.mxu1 %v8029_v16 }
 0x2b0   : > { %7293 = vmatmul.mubr.msk.f32.vlgmr.msra.gmra.mxu1 %vm1301_vm2, %v8803_v42 }
 0x2b1   : > { %7301 = vmatpush3.xpose.msk.msra.mxu1 %vm1301_vm2, %v8813_v30  ;;  %7302 = vmatprep.mubr.msk.f32.mxu1 %vm8030_vm1, %v8029_v16 }
 0x2b2   : > { %7310 = vmatprep.subr.mxu1 %v8029_v16 }
 0x2b4   : > { %7303 = vmatmul.mubr.msk.f32.vlgmr.msra.gmra.mxu1 %vm1301_vm2, %v8813_v30 }
 0x2b5   : > { %7311 = vmatpush3.xpose.msk.msra.mxu1 %vm1301_vm2, %v8822_v25  ;;  %7312 = vmatprep.mubr.msk.f32.mxu1 %vm8030_vm1, %v8029_v16 }
 0x2b6   : > { %7320 = vmatprep.subr.mxu1 %v8029_v16 }
 0x2b8   : > { %7313 = vmatmul.mubr.msk.f32.vlgmr.msra.gmra.mxu1 %vm1301_vm2, %v8822_v25 }
 0x2b9   : > { %7321 = vmatpush3.msra.mxu1 %v8633_v26  ;;  %7322 = vmatprep.mubr.msk.f32.mxu1 %vm8030_vm1, %v8029_v16 }
 0x2ba   : > { %7330 = vmatprep.subr.mxu1 %v8029_v16 }
 0x34c   : > { %v1371_v12 = vpop.f32.mrf.mxu1 }
 0x34d   : > { %v8837_v59 = vmul.f32 0.5, %v1371_v12 }
 0x34e   : > { %v7244_v62 = vpop.f32.mrf.mxu1 }
 0x34f   : > { %v2487_v27 = vsel %vm2486_vm3, %v8837_v59, -inf }
 0x350   : > { %2488 = vmax.xlane.f32.xlu0 %v2487_v27  ;;  %v1444_v34 = vpop.f32.mrf.mxu1 }
 0x351   : > { %v8841_v10 = vmul.f32 0.5, %v1444_v34 }
 0x352   : > { %v7249_v19 = vpop.f32.mrf.mxu1 }
 0x353   : > { %v2490_v58 = vsel %vm2486_vm3, %v8841_v10, -inf }
 0x354   : > { %2491 = vmax.xlane.f32.xlu1 %v2490_v58  ;;  %v1517_v20 = vpop.f32.mrf.mxu1 }
 0x355   : > { %v8845_v48 = vmul.f32 0.5, %v1517_v20 }
 0x356   : > { %v7254_v3 = vpop.f32.mrf.mxu1 }
 0x357   : > { %v2493_v61 = vsel %vm2486_vm3, %v8845_v48, -inf }
 0x358   : > { %2494 = vmax.xlane.f32.xlu0 %v2493_v61  ;;  %v1590_v6 = vpop.f32.mrf.mxu1 }
 0x359   : > { %v8849_v23 = vmul.f32 0.5, %v1590_v6 }
 0x35a   : > { %v7259_v15 = vpop.f32.mrf.mxu1 }
 0x35b   : > { %v2496_v8 = vsel %vm2486_vm3, %v8849_v23, -inf }
 0x35c   : > { %v2028_v22 = vpop.f32.mrf.mxu0  ;;  %2497 = vmax.xlane.f32.xlu1 %v2496_v8  ;;  %v1663_v49 = vpop.f32.mrf.mxu1 }
 0x35d   : > { %v8853_v4 = vmul.f32 0.5, %v1663_v49  ;;  %v8867_v33 = vmul.f32 0.5, %v2028_v22 }
 0x35e   : > { %v7289_v5 = vpop.f32.mrf.mxu0  ;;  %v7264_v37 = vpop.f32.mrf.mxu1 }
 0x35f   : > { %v2499_v40 = vsel %vm2486_vm3, %v8853_v4, -inf  ;;  %v2514_v12 = vsel %vm2486_vm3, %v8867_v33, -inf }
 0x360   : > { %v2174_v29 = vpop.f32.mrf.mxu0  ;;  %2500 = vmax.xlane.f32.xlu0 %v2499_v40  ;;  %v1736_v51 = vpop.f32.mrf.mxu1 }
 0x361   : > { %v8857_v39 = vmul.f32 0.5, %v1736_v51  ;;  %v8871_v44 = vmul.f32 0.5, %v2174_v29 }
 0x362   : > { %v7299_v38 = vpop.f32.mrf.mxu0  ;;  %v7269_v2 = vpop.f32.mrf.mxu1 }
 0x363   : > { %v2502_v32 = vsel %vm2486_vm3, %v8857_v39, -inf  ;;  %v2520_v20 = vsel %vm2486_vm3, %v8871_v44, -inf }
 0x364   : > { %v2320_v46 = vpop.f32.mrf.mxu0  ;;  %2503 = vmax.xlane.f32.xlu1 %v2502_v32  ;;  %v1809_v24 = vpop.f32.mrf.mxu1 }
 0x365   : > { %v8861_v56 = vmul.f32 0.5, %v1809_v24  ;;  %v8878_v58 = vmul.f32 0.5, %v2320_v46 }
 0x366   : > { %v7309_v47 = vpop.f32.mrf.mxu0  ;;  %v7274_v7 = vpop.f32.mrf.mxu1 }
 0x367   : > { %v2505_v45 = vsel %vm2486_vm3, %v8861_v56, -inf  ;;  %v2526_v22 = vsel %vm2486_vm3, %v8878_v58, -inf }
 0x368   : > { %v2466_v50 = vpop.f32.mrf.mxu0  ;;  %2506 = vmax.xlane.f32.xlu0 %v2505_v45  ;;  %v1882_v63 = vpop.f32.mrf.mxu1 }
 0x369   : > { %v8865_v28 = vmul.f32 0.5, %v1882_v63  ;;  %v8886_v8 = vmul.f32 0.5, %v2466_v50 }
 0x36a   : > { %v7319_v11 = vpop.f32.mrf.mxu0  ;;  %v7279_v0 = vpop.f32.mrf.mxu1 }
 0x36b   : > { %v2508_v21 = vsel %vm2486_vm3, %v8865_v28, -inf  ;;  %v2532_v29 = vsel %vm2486_vm3, %v8886_v8, -inf }
 0x36c   : > { %2509 = vmax.xlane.f32.xlu1 %v2508_v21  ;;  %v1955_v18 = vpop.f32.mrf.mxu1 }
 0x36d   : > { %v2478_v31 = vmul.f32 0.5, %v1955_v18 }
 0x36e   : > { %v7284_v35 = vpop.f32.mrf.mxu1 }
 0x36f   : > { %v2511_v62 = vsel %vm2486_vm3, %v2478_v31, -inf }
 0x370   : > { %2515 = vmax.xlane.f32.xlu1 %v2514_v12  ;;  %2512 = vmax.xlane.f32.xlu0 %v2511_v62  ;;  %v2101_v27 = vpop.f32.mrf.mxu1 }
 0x371   : > { %v8876_v34 = vmul.f32 0.5, %v2101_v27 }
 0x372   : > { %v7294_v19 = vpop.f32.mrf.mxu1 }
 0x373   : > { %v2517_v3 = vsel %vm2486_vm3, %v8876_v34, -inf }
 0x374   : > { %2521 = vmax.xlane.f32.xlu1 %v2520_v20  ;;  %2518 = vmax.xlane.f32.xlu0 %v2517_v3  ;;  %v2247_v61 = vpop.f32.mrf.mxu1 }
 0x375   : > { %v8884_v6 = vmul.f32 0.5, %v2247_v61 }
 0x376   : > { %v7304_v15 = vpop.f32.mrf.mxu1 }
 0x377   : > { %v2523_v49 = vsel %vm2486_vm3, %v8884_v6, -inf }
 0x378   : > { %2527 = vmax.xlane.f32.xlu1 %v2526_v22  ;;  %2524 = vmax.xlane.f32.xlu0 %v2523_v49  ;;  %v2393_v5 = vpop.f32.mrf.mxu1 }
 0x379   : > { %v8892_v37 = vmul.f32 0.5, %v2393_v5 }
 0x37a   : > { %v7314_v40 = vpop.f32.mrf.mxu1 }
 0x37b   : > { %v2529_v51 = vsel %vm2486_vm3, %v8892_v37, -inf }
 0x37c   : > { %2533 = vmax.xlane.f32.xlu1 %v2532_v29  ;;  %2530 = vmax.xlane.f32.xlu0 %v2529_v51 }
 0x3d9   : > { %v2489_v38 = vpop.xlane.xlu0 %2488 }
 0x3da   : > { %v2535_v2 = vsub.f32 %v8837_v59, %v2489_v38 }
 0x3dc   : > { %v2551_v32 = vmul.f32 1.442695, %v2535_v2 }
 0x3dd   : > { %v2492_v7 = vpop.xlane.xlu1 %2491 }
 0x3de   : > { %7698 = vpow2.f32 %v2551_v32  ;;  %v2536_v49 = vsub.f32 %v8841_v10, %v2492_v7 }
 0x3e0   : > { %v2553_v38 = vmul.f32 1.442695, %v2536_v49 }
 0x3e1   : > { %v2495_v46 = vpop.xlane.xlu0 %2494 }
 0x3e2   : > { %v2537_v24 = vsub.f32 %v8845_v48, %v2495_v46 }
 0x3e4   : > { %v2555_v47 = vmul.f32 1.442695, %v2537_v24 }
 0x3e5   : > { %v2498_v21 = vpop.xlane.xlu1 %2497 }
 0x3e6   : > { %7700 = vpow2.f32 %v2555_v47  ;;  %v2538_v2 = vsub.f32 %v8849_v23, %v2498_v21 }
 0x3e9   : > { %v2501_v45 = vpop.xlane.xlu0 %2500 }
 0x3ea   : > { %v2539_v50 = vsub.f32 %v8853_v4, %v2501_v45 }
 0x3eb   : > { %v8901_v63 = vpop.eup %7698 }
 0x3ec   : > { %v2559_v11 = vmul.f32 1.442695, %v2539_v50  ;;  %v2583_v0 = vsel %vm2486_vm3, %v8901_v63, 0.0 }
 0x3ed   : > { %2584 = vadd.xlane.f32.xlu0 %v2583_v0  ;;  %v2504_v59 = vpop.xlane.xlu1 %2503 }
 0x3ee   : > { %7702 = vpow2.f32 %v2559_v11 }
 0x3f1   : > { %v2507_v18 = vpop.xlane.xlu0 %2506 }
 0x3f2   : > { %v2541_v35 = vsub.f32 %v8861_v56, %v2507_v18 }
 0x3f3   : > { %v8906_v48 = vpop.eup %7700 }
 0x3f4   : > { %v2563_v12 = vmul.f32 1.442695, %v2541_v35  ;;  %v2589_v62 = vsel %vm2486_vm3, %v8906_v48, 0.0 }
 0x3f5   : > { %2590 = vadd.xlane.f32.xlu0 %v2589_v62  ;;  %v2510_v4 = vpop.xlane.xlu1 %2509 }
 0x3f6   : > { %7704 = vpow2.f32 %v2563_v12  ;;  %v2542_v11 = vsub.f32 %v8865_v28, %v2510_v4 }
 0x3f9   : > { %v2513_v27 = vpop.xlane.xlu0 %2512  ;;  %v2516_v19 = vpop.xlane.xlu1 %2515 }
 0x3fa   : > { %v2543_v20 = vsub.f32 %v2478_v31, %v2513_v27  ;;  %v2544_v3 = vsub.f32 %v8867_v33, %v2516_v19 }
 0x3fb   : > { %v8911_v61 = vpop.eup %7702 }
 0x3fc   : > { %v2567_v15 = vmul.f32 1.442695, %v2543_v20  ;;  %v2569_v22 = vmul.f32 1.442695, %v2544_v3  ;;  %v2595_v56 = vsel %vm2486_vm3, %v8911_v61, 0.0 }
 0x3fd   : > { %v2519_v5 = vpop.xlane.xlu0 %2518  ;;  %2596 = vadd.xlane.f32.xlu0 %v2595_v56  ;;  %v2522_v40 = vpop.xlane.xlu1 %2521 }
 0x3fe   : > { %7706 = vpow2.f32 %v2567_v15  ;;  %v2545_v29 = vsub.f32 %v8876_v34, %v2519_v5  ;;  %v2546_v51 = vsub.f32 %v8871_v44, %v2522_v40  ;;  %v2557_v34 = vmul.f32 1.442695, %v2538_v2 }
 0x3ff   : > { %7708 = vpow2.f32 %v2569_v22  ;;  %v2540_v44 = vsub.f32 %v8857_v39, %v2504_v59  ;;  %v2565_v39 = vmul.f32 1.442695, %v2542_v11 }
 0x400   : > { %v2571_v31 = vmul.f32 1.442695, %v2545_v29  ;;  %v2573_v33 = vmul.f32 1.442695, %v2546_v51 }
 0x401   : > { %v2525_v32 = vpop.xlane.xlu0 %2524  ;;  %v2528_v45 = vpop.xlane.xlu1 %2527 }
 0x402   : > { %7710 = vpow2.f32 %v2571_v31  ;;  %v2547_v46 = vsub.f32 %v8884_v6, %v2525_v32  ;;  %v2561_v6 = vmul.f32 1.442695, %v2540_v44  ;;  %v2548_v59 = vsub.f32 %v8878_v58, %v2528_v45 }
 0x403   : > { %v8920_v24 = vpop.eup %7704  ;;  %7712 = vpow2.f32 %v2573_v33 }
 0x404   : > { %v2575_v10 = vmul.f32 1.442695, %v2547_v46  ;;  %v2601_v47 = vsel %vm2486_vm3, %v8920_v24, 0.0  ;;  %7714 = vpow2.f32 %v2553_v38  ;;  %v2577_v4 = vmul.f32 1.442695, %v2548_v59 }
 0x405   : > { %2602 = vadd.xlane.f32.xlu0 %v2601_v47  ;;  %v2531_v7 = vpop.xlane.xlu0 %2530  ;;  %v2534_v35 = vpop.xlane.xlu1 %2533 }
 0x406   : > { %7716 = vpow2.f32 %v2575_v10  ;;  %v2549_v23 = vsub.f32 %v8892_v37, %v2531_v7  ;;  %v2550_v27 = vsub.f32 %v8886_v8, %v2534_v35 }
 0x407   : > { %7718 = vpow2.f32 %v2557_v34 }
 0x408   : > { %v2579_v50 = vmul.f32 1.442695, %v2549_v23  ;;  %v2581_v15 = vmul.f32 1.442695, %v2550_v27 }
 0x40a   : > { %7720 = vpow2.f32 %v2579_v50 }
 0x40b   : > { %v8927_v0 = vpop.eup %7706  ;;  %7722 = vpow2.f32 %v2561_v6 }
 0x40c   : > { %v8929_v21 = vpop.eup %7708  ;;  %v2607_v18 = vsel %vm2486_vm3, %v8927_v0, 0.0  ;;  %7724 = vpow2.f32 %v2565_v39 }
 0x40d   : > { %2608 = vadd.xlane.f32.xlu0 %v2607_v18  ;;  %v2610_v37 = vsel %vm2486_vm3, %v8929_v21, 0.0  ;;  %7726 = vpow2.f32 %v2577_v4 }
 0x40e   : > { %2611 = vadd.xlane.f32.xlu1 %v2610_v37  ;;  %7728 = vpow2.f32 %v2581_v15 }
 0x40f   : > { %v8936_v12 = vpop.eup %7710 }
 0x410   : > { %v8938_v28 = vpop.eup %7712  ;;  %v2613_v62 = vsel %vm2486_vm3, %v8936_v12, 0.0 }
 0x411   : > { %2614 = vadd.xlane.f32.xlu0 %v2613_v62  ;;  %v2616_v58 = vsel %vm2486_vm3, %v8938_v28, 0.0  ;;  %v8945_v19 = vpop.eup %7714 }
 0x412   : > { %2617 = vadd.xlane.f32.xlu1 %v2616_v58  ;;  %v2586_v22 = vsel %vm2486_vm3, %v8945_v19, 0.0 }
 0x413   : > { %v8947_v20 = vpop.eup %7716 }
 0x414   : > { %v2619_v3 = vsel %vm2486_vm3, %v8947_v20, 0.0  ;;  %v8953_v56 = vpop.eup %7718 }
 0x415   : > { %2620 = vadd.xlane.f32.xlu0 %v2619_v3  ;;  %v2592_v5 = vsel %vm2486_vm3, %v8953_v56, 0.0 }
 0x416   : > { %2587 = vadd.xlane.f32.xlu1 %v2586_v22 }
 0x417   : > { %v8955_v8 = vpop.eup %7720 }
 0x418   : > { %v2625_v49 = vsel %vm2486_vm3, %v8955_v8, 0.0  ;;  %v8961_v40 = vpop.eup %7722 }
 0x419   : > { %2626 = vadd.xlane.f32.xlu0 %v2625_v49  ;;  %v2598_v29 = vsel %vm2486_vm3, %v8961_v40, 0.0  ;;  %v8965_v51 = vpop.eup %7724 }
 0x41a   : > { %2593 = vadd.xlane.f32.xlu1 %v2592_v5  ;;  %v2604_v31 = vsel %vm2486_vm3, %v8965_v51, 0.0  ;;  %v8969_v33 = vpop.eup %7726 }
 0x41b   : > { %v2622_v38 = vsel %vm2486_vm3, %v8969_v33, 0.0  ;;  %v8973_v2 = vpop.eup %7728 }
 0x41c   : > { %v2628_v32 = vsel %vm2486_vm3, %v8973_v2, 0.0 }
 0x41e   : > { %2599 = vadd.xlane.f32.xlu1 %v2598_v29 }
 0x422   : > { %2605 = vadd.xlane.f32.xlu1 %v2604_v31 }
 0x426   : > { %2623 = vadd.xlane.f32.xlu1 %v2622_v38 }
 0x42a   : > { %2629 = vadd.xlane.f32.xlu1 %v2628_v32 }
 0x42f   : > { %3847 = vrot.lane.b32.xlu0 %v8633_v26, %s8033_s11 }
 0x433   : > { %4143 = vrot.lane.b32.xlu0 %v8714_v53, %s8033_s11 }
 0x437   : > { %4291 = vrot.lane.b32.xlu0 %v8756_v43, %s8033_s11 }
 0x43b   : > { %3921 = vrot.lane.b32.xlu1 %v8655_v41, %s8033_s11  ;;  %4439 = vrot.lane.b32.xlu0 %v8791_v54, %s8033_s11 }
 0x43f   : > { %3995 = vrot.lane.b32.xlu1 %v8677_v14, %s8033_s11  ;;  %4587 = vrot.lane.b32.xlu0 %v8803_v42, %s8033_s11 }
 0x443   : > { %4069 = vrot.lane.b32.xlu1 %v8695_v55, %s8033_s11  ;;  %4735 = vrot.lane.b32.xlu0 %v8813_v30, %s8033_s11 }
 0x447   : > { %4217 = vrot.lane.b32.xlu1 %v8734_v1, %s8033_s11  ;;  %4883 = vrot.lane.b32.xlu0 %v8822_v25, %s8033_s11 }
 0x44b   : > { %4365 = vrot.lane.b32.xlu1 %v8775_v52, %s8033_s11 }
 0x44f   : > { %4513 = vrot.lane.b32.xlu1 %v8710_v9, %s8033_s11 }
 0x453   : > { %4661 = vrot.lane.b32.xlu1 %v8729_v13, %s8033_s11 }
 0x457   : > { %4809 = vrot.lane.b32.xlu1 %v8750_v17, %s8033_s11 }
 0x45b   : > { %4957 = vrot.lane.b32.xlu1 %v8770_v60, %s8033_s11 }
 0x476   : > { %v2585_v26 = vpop.xlane.xlu0 %2584 }
 0x477   : > { %7730 = vrcp.f32 %v2585_v26 }
 0x47e   : > { %v2591_v41 = vpop.xlane.xlu0 %2590 }
 0x47f   : > { %7732 = vrcp.f32 %v2591_v41 }
 0x484   : > { %v7731_v46 = vpop.eup %7730 }
 0x485   : > { %v2663_v10 = vmul.f32 %v7731_v46, %v8901_v63 }
 0x486   : > { %v2597_v47 = vpop.xlane.xlu0 %2596 }
 0x487   : > { %7734 = vrcp.f32 %v2597_v47  ;;  %7323 = vmatmul.mubr.msk.f32.vlgmr.msra.gmra.mxu1 %vm2486_vm3, %v2663_v10 }
 0x488   : > { %7331 = vmatpush3.msra.mxu1 %v8677_v14  ;;  %7332 = vmatprep.mubr.msk.f32.mxu1 %vm8030_vm1, %v8029_v16 }
 0x489   : > { %7340 = vmatprep.subr.mxu1 %v8029_v16 }
 0x48c   : > { %v7733_v34 = vpop.eup %7732 }
 0x48d   : > { %v2665_v44 = vmul.f32 %v7733_v34, %v8906_v48 }
 0x48e   : > { %v2603_v7 = vpop.xlane.xlu0 %2602 }
 0x48f   : > { %7736 = vrcp.f32 %v2603_v7  ;;  %7333 = vmatmul.mubr.msk.f32.vlgmr.msra.gmra.mxu1 %vm2486_vm3, %v2665_v44 }
 0x490   : > { %7341 = vmatpush3.msra.mxu1 %v8714_v53  ;;  %7342 = vmatprep.mubr.msk.f32.mxu1 %vm8030_vm1, %v8029_v16 }
 0x491   : > { %7350 = vmatprep.subr.mxu1 %v8029_v16 }
 0x494   : > { %v7735_v14 = vpop.eup %7734 }
 0x495   : > { %v2667_v63 = vmul.f32 %v7735_v14, %v8911_v61 }
 0x496   : > { %v2609_v23 = vpop.xlane.xlu0 %2608 }
 0x497   : > { %7738 = vrcp.f32 %v2609_v23  ;;  %v2612_v45 = vpop.xlane.xlu1 %2611  ;;  %7343 = vmatmul.mubr.msk.f32.vlgmr.msra.gmra.mxu1 %vm2486_vm3, %v2667_v63 }
 0x498   : > { %7351 = vmatpush3.msra.mxu1 %v8756_v43  ;;  %7352 = vmatprep.mubr.msk.f32.mxu1 %vm8030_vm1, %v8029_v16 }
 0x499   : > { %7360 = vmatprep.subr.mxu1 %v8029_v16 }
 0x49a   : > { %v2615_v53 = vpop.xlane.xlu0 %2614 }
 0x49b   : > { %7740 = vrcp.f32 %v2615_v53  ;;  %v2618_v48 = vpop.xlane.xlu1 %2617 }
 0x49c   : > { %v7737_v50 = vpop.eup %7736 }
 0x49d   : > { %v2669_v6 = vmul.f32 %v7737_v50, %v8920_v24 }
 0x49e   : > { %v2621_v11 = vpop.xlane.xlu0 %2620 }
 0x49f   : > { %7742 = vrcp.f32 %v2621_v11  ;;  %v2588_v61 = vpop.xlane.xlu1 %2587  ;;  %7353 = vmatmul.mubr.msk.f32.vlgmr.msra.gmra.mxu1 %vm2486_vm3, %v2669_v6 }
 0x4a0   : > { %7744 = vrcp.f32 %v2588_v61  ;;  %7361 = vmatpush3.msra.mxu1 %v8791_v54  ;;  %7362 = vmatprep.mubr.msk.f32.mxu1 %vm8030_vm1, %v8029_v16 }
 0x4a1   : > { %7370 = vmatprep.subr.mxu1 %v8029_v16 }
 0x4a2   : > { %v2627_v43 = vpop.xlane.xlu0 %2626 }
 0x4a3   : > { %7746 = vrcp.f32 %v2627_v43  ;;  %v2594_v18 = vpop.xlane.xlu1 %2593 }
 0x4a4   : > { %v7739_v39 = vpop.eup %7738  ;;  %7748 = vrcp.f32 %v2594_v18 }
 0x4a5   : > { %v2671_v24 = vmul.f32 %v7739_v39, %v8927_v0 }
 0x4a6   : > { %v9031_v27 = vpop.permute.xlu0 %3847 }
 0x4a7   : > { %v2600_v59 = vpop.xlane.xlu1 %2599  ;;  %7363 = vmatmul.mubr.msk.f32.vlgmr.msra.gmra.mxu1 %vm2486_vm3, %v2671_v24 }
 0x4a8   : > { %v7741_v37 = vpop.eup %7740  ;;  %7750 = vrcp.f32 %v2600_v59  ;;  %7371 = vmatpush3.msra.mxu1 %v8803_v42  ;;  %7372 = vmatprep.mubr.msk.f32.mxu1 %vm8030_vm1, %v8029_v16 }
 0x4a9   : > { %7380 = vmatprep.subr.mxu1 %v8029_v16  ;;  %v2673_v54 = vmul.f32 %v7741_v37, %v8936_v12 }
 0x4ab   : > { %v2606_v35 = vpop.xlane.xlu1 %2605  ;;  %7373 = vmatmul.mubr.msk.f32.vlgmr.msra.gmra.mxu1 %vm2486_vm3, %v2673_v54 }
 0x4ac   : > { %v7743_v62 = vpop.eup %7742  ;;  %7752 = vrcp.f32 %v2606_v35  ;;  %7381 = vmatpush3.msra.mxu1 %v8813_v30  ;;  %7382 = vmatprep.mubr.msk.f32.mxu1 %vm8030_vm1, %v8029_v16 }
 0x4ad   : > { %v7745_v0 = vpop.eup %7744  ;;  %7390 = vmatprep.subr.mxu1 %v8029_v16  ;;  %v2675_v42 = vmul.f32 %v7743_v62, %v8947_v20  ;;  %7754 = vrcp.f32 %v2612_v45 }
 0x4ae   : > { %v2664_v4 = vmul.f32 %v7745_v0, %v8945_v19  ;;  %7756 = vrcp.f32 %v2618_v48 }
 0x4af   : > { %v2624_v12 = vpop.xlane.xlu1 %2623  ;;  %7383 = vmatmul.mubr.msk.f32.vlgmr.msra.gmra.mxu1 %vm2486_vm3, %v2675_v42 }
 0x4b0   : > { %v7747_v58 = vpop.eup %7746  ;;  %7328 = vmatmul.mubr.msk.f32.vlgmr.msra.gmra.mxu0 %vm2486_vm3, %v2664_v4  ;;  %7391 = vmatpush3.msra.mxu1 %v8822_v25  ;;  %v9049_v25 = vpop.permute.xlu0 %4143  ;;  %7758 = vrcp.f32 %v2624_v12 }
 0x4b1   : > { %v7749_v30 = vpop.eup %7748  ;;  %7336 = vmatpush3.msra.mxu0 %v8695_v55  ;;  %7392 = vmatprep.mubr.msk.f32.mxu1 %vm8030_vm1, %v8029_v16  ;;  %v2677_v20 = vmul.f32 %v7747_v58, %v8955_v8 }
 0x4b2   : > { %7400 = vmatprep.subr.mxu1 %v8029_v16  ;;  %7337 = vmatprep.mubr.msk.f32.mxu0 %vm8030_vm1, %v8029_v16  ;;  %v2666_v19 = vmul.f32 %v7749_v30, %v8953_v56 }
 0x4b3   : > { %7345 = vmatprep.subr.mxu0 %v8029_v16  ;;  %v2630_v3 = vpop.xlane.xlu1 %2629  ;;  %7393 = vmatmul.mubr.msk.f32.vlgmr.msra.gmra.mxu1 %vm2486_vm3, %v2677_v20 }
 0x4b4   : > { %7338 = vmatmul.mubr.msk.f32.vlgmr.msra.gmra.mxu0 %vm2486_vm3, %v2666_v19  ;;  %7401 = vmatpush3.xpose.msk.msra.mxu1 %vm1301_vm2, %v9031_v27  ;;  %7760 = vrcp.f32 %v2630_v3  ;;  %v9071_v49 = vpop.permute.xlu0 %4291 }
 0x4b5   : > { %v7751_v55 = vpop.eup %7750  ;;  %7346 = vmatpush3.msra.mxu0 %v8734_v1  ;;  %7402 = vmatprep.mubr.msk.f32.mxu1 %vm8030_vm1, %v8029_v16 }
 0x4b6   : > { %7347 = vmatprep.mubr.msk.f32.mxu0 %vm8030_vm1, %v8029_v16  ;;  %7355 = vmatprep.subr.mxu0 %v8029_v16  ;;  %v2668_v15 = vmul.f32 %v7751_v55, %v8961_v40 }
 0x4b7   : > { %v9058_v22 = vpop.permute.xlu1 %3921  ;;  %7403 = vmatmul.mubr.msk.f32.vlgmr.msra.gmra.mxu1 %vm1301_vm2, %v9031_v27  ;;  %7410 = vmatprep.subr.mxu1 %v8029_v16 }
 0x4b8   : > { %7348 = vmatmul.mubr.msk.f32.vlgmr.msra.gmra.mxu0 %vm2486_vm3, %v2668_v15  ;;  %7412 = vmatprep.mubr.msk.f32.mxu1 %vm8030_vm1, %v8029_v16  ;;  %v9089_v29 = vpop.permute.xlu0 %4439 }
 0x4b9   : > { %v7753_v1 = vpop.eup %7752  ;;  %7356 = vmatpush3.msra.mxu0 %v8775_v52  ;;  %7357 = vmatprep.mubr.msk.f32.mxu0 %vm8030_vm1, %v8029_v16 }
 0x4ba   : > { %7365 = vmatprep.subr.mxu0 %v8029_v16  ;;  %v2670_v56 = vmul.f32 %v7753_v1, %v8965_v51  ;;  %v7755_v8 = vpop.eup %7754 }
 0x4bb   : > { %v9073_v5 = vpop.permute.xlu1 %3995  ;;  %v2672_v52 = vmul.f32 %v7755_v8, %v8929_v21  ;;  %v7757_v40 = vpop.eup %7756 }
 0x4bc   : > { %7358 = vmatmul.mubr.msk.f32.vlgmr.msra.gmra.mxu0 %vm2486_vm3, %v2670_v56  ;;  %7411 = vmatpush3.xpose.msk.msra.mxu1 %vm1301_vm2, %v9073_v5  ;;  %v9113_v31 = vpop.permute.xlu0 %4587 }
 0x4bd   : > { %7366 = vmatpush3.msra.mxu0 %v8710_v9  ;;  %7367 = vmatprep.mubr.msk.f32.mxu0 %vm8030_vm1, %v8029_v16  ;;  %v2674_v9 = vmul.f32 %v7757_v40, %v8938_v28  ;;  %v7759_v21 = vpop.eup %7758 }
 0x4be   : > { %7375 = vmatprep.subr.mxu0 %v8029_v16  ;;  %7420 = vmatprep.subr.mxu1 %v8029_v16 }
 0x4bf   : > { %7413 = vmatmul.mubr.msk.f32.vlgmr.msra.gmra.mxu1 %vm1301_vm2, %v9073_v5  ;;  %v9101_v51 = vpop.permute.xlu1 %4069 }
 0x4c0   : > { %7368 = vmatmul.mubr.msk.f32.vlgmr.msra.gmra.mxu0 %vm2486_vm3, %v2672_v52  ;;  %7421 = vmatpush3.xpose.msk.msra.mxu1 %vm1301_vm2, %v9049_v25 }
 0x4c1   : > { %7376 = vmatpush3.msra.mxu0 %v8729_v13  ;;  %7422 = vmatprep.mubr.msk.f32.mxu1 %vm8030_vm1, %v8029_v16  ;;  %v2676_v13 = vmul.f32 %v7759_v21, %v8969_v33  ;;  %v7761_v28 = vpop.eup %7760 }
 0x4c2   : > { %7377 = vmatprep.mubr.msk.f32.mxu0 %vm8030_vm1, %v8029_v16  ;;  %7385 = vmatprep.subr.mxu0 %v8029_v16  ;;  %v2678_v33 = vmul.f32 %v7761_v28, %v8973_v2 }
 0x4c3   : > { %7423 = vmatmul.mubr.msk.f32.vlgmr.msra.gmra.mxu1 %vm1301_vm2, %v9049_v25  ;;  %7430 = vmatprep.subr.mxu1 %v8029_v16 }
 0x4c4   : > { %7378 = vmatmul.mubr.msk.f32.vlgmr.msra.gmra.mxu0 %vm2486_vm3, %v2674_v9  ;;  %7431 = vmatpush3.xpose.msk.msra.mxu1 %vm1301_vm2, %v9071_v49 }
 0x4c5   : > { %7386 = vmatpush3.msra.mxu0 %v8750_v17  ;;  %7432 = vmatprep.mubr.msk.f32.mxu1 %vm8030_vm1, %v8029_v16  ;;  %v9124_v17 = vpop.permute.xlu1 %4217 }
 0x4c6   : > { %7387 = vmatprep.mubr.msk.f32.mxu0 %vm8030_vm1, %v8029_v16  ;;  %7395 = vmatprep.subr.mxu0 %v8029_v16 }
 0x4c7   : > { %7433 = vmatmul.mubr.msk.f32.vlgmr.msra.gmra.mxu1 %vm1301_vm2, %v9071_v49  ;;  %7440 = vmatprep.subr.mxu1 %v8029_v16 }
 0x4c8   : > { %7388 = vmatmul.mubr.msk.f32.vlgmr.msra.gmra.mxu0 %vm2486_vm3, %v2676_v13  ;;  %7441 = vmatpush3.xpose.msk.msra.mxu1 %vm1301_vm2, %v9089_v29 }
 0x4c9   : > { %7396 = vmatpush3.msra.mxu0 %v8770_v60  ;;  %7442 = vmatprep.mubr.msk.f32.mxu1 %vm8030_vm1, %v8029_v16  ;;  %v9136_v60 = vpop.permute.xlu0 %4735  ;;  %v9148_v38 = vpop.permute.xlu1 %4365 }
 0x4ca   : > { %7397 = vmatprep.mubr.msk.f32.mxu0 %vm8030_vm1, %v8029_v16  ;;  %7405 = vmatprep.subr.mxu0 %v8029_v16 }
 0x4cb   : > { %7443 = vmatmul.mubr.msk.f32.vlgmr.msra.gmra.mxu1 %vm1301_vm2, %v9089_v29  ;;  %7450 = vmatprep.subr.mxu1 %v8029_v16 }
 0x4cc   : > { %7398 = vmatmul.mubr.msk.f32.vlgmr.msra.gmra.mxu0 %vm2486_vm3, %v2678_v33  ;;  %7451 = vmatpush3.xpose.msk.msra.mxu1 %vm1301_vm2, %v9113_v31 }
 0x4cd   : > { %7406 = vmatpush3.xpose.msk.msra.mxu0 %vm1301_vm2, %v9058_v22  ;;  %7452 = vmatprep.mubr.msk.f32.mxu1 %vm8030_vm1, %v8029_v16  ;;  %v9161_v2 = vpop.permute.xlu0 %4883  ;;  %v9174_v32 = vpop.permute.xlu1 %4513 }
 0x4ce   : > { %7407 = vmatprep.mubr.msk.f32.mxu0 %vm8030_vm1, %v8029_v16  ;;  %7415 = vmatprep.subr.mxu0 %v8029_v16 }
 0x4cf   : > { %7453 = vmatmul.mubr.msk.f32.vlgmr.msra.gmra.mxu1 %vm1301_vm2, %v9113_v31  ;;  %7460 = vmatprep.subr.mxu1 %v8029_v16 }
 0x4d0   : > { %7408 = vmatmul.mubr.msk.f32.vlgmr.msra.gmra.mxu0 %vm1301_vm2, %v9058_v22  ;;  %7461 = vmatpush3.xpose.msk.msra.mxu1 %vm1301_vm2, %v9136_v60 }
 0x4d1   : > { %7416 = vmatpush3.xpose.msk.msra.mxu0 %vm1301_vm2, %v9101_v51  ;;  %7462 = vmatprep.mubr.msk.f32.mxu1 %vm8030_vm1, %v8029_v16  ;;  %v9193_v26 = vpop.permute.xlu1 %4661 }
 0x4d2   : > { %7417 = vmatprep.mubr.msk.f32.mxu0 %vm8030_vm1, %v8029_v16  ;;  %7425 = vmatprep.subr.mxu0 %v8029_v16 }
 0x4d3   : > { %7463 = vmatmul.mubr.msk.f32.vlgmr.msra.gmra.mxu1 %vm1301_vm2, %v9136_v60  ;;  %7470 = vmatprep.subr.mxu1 %v8029_v16 }
 0x4d4   : > { %7418 = vmatmul.mubr.msk.f32.vlgmr.msra.gmra.mxu0 %vm1301_vm2, %v9101_v51  ;;  %7471 = vmatpush3.xpose.msk.msra.mxu1 %vm1301_vm2, %v9161_v2 }
 0x4d5   : > { %7426 = vmatpush3.xpose.msk.msra.mxu0 %vm1301_vm2, %v9124_v17  ;;  %7472 = vmatprep.mubr.msk.f32.mxu1 %vm8030_vm1, %v8029_v16  ;;  %v9208_v41 = vpop.permute.xlu1 %4809 }
 0x4d6   : > { %7427 = vmatprep.mubr.msk.f32.mxu0 %vm8030_vm1, %v8029_v16  ;;  %7435 = vmatprep.subr.mxu0 %v8029_v16 }
 0x4d7   : > { %7473 = vmatmul.mubr.msk.f32.vlgmr.msra.gmra.mxu1 %vm1301_vm2, %v9161_v2  ;;  %7480 = vmatprep.subr.mxu1 %v8029_v16 }
 0x4d8   : > { %7428 = vmatmul.mubr.msk.f32.vlgmr.msra.gmra.mxu0 %vm1301_vm2, %v9124_v17  ;;  %7481 = vmatpush3.msra.mxu1 %v9031_v27 }
 0x4d9   : > { %7436 = vmatpush3.xpose.msk.msra.mxu0 %vm1301_vm2, %v9148_v38  ;;  %7437 = vmatprep.mubr.msk.f32.mxu0 %vm8030_vm1, %v8029_v16  ;;  %v9218_v46 = vpop.permute.xlu1 %4957 }
 0x4da   : > { %7445 = vmatprep.subr.mxu0 %v8029_v16  ;;  %7482 = vmatprep.mubr.msk.f32.mxu1 %vm8030_vm1, %v8029_v16 }
 0x4db   : > { %7490 = vmatprep.subr.mxu1 %v8029_v16 }
 0x4dc   : > { %7438 = vmatmul.mubr.msk.f32.vlgmr.msra.gmra.mxu0 %vm1301_vm2, %v9148_v38 }
 0x4dd   : > { %7446 = vmatpush3.xpose.msk.msra.mxu0 %vm1301_vm2, %v9174_v32  ;;  %7447 = vmatprep.mubr.msk.f32.mxu0 %vm8030_vm1, %v8029_v16 }
 0x4de   : > { %7455 = vmatprep.subr.mxu0 %v8029_v16 }
 0x4e0   : > { %7448 = vmatmul.mubr.msk.f32.vlgmr.msra.gmra.mxu0 %vm1301_vm2, %v9174_v32 }
 0x4e1   : > { %7456 = vmatpush3.xpose.msk.msra.mxu0 %vm1301_vm2, %v9193_v26  ;;  %7457 = vmatprep.mubr.msk.f32.mxu0 %vm8030_vm1, %v8029_v16 }
 0x4e2   : > { %7465 = vmatprep.subr.mxu0 %v8029_v16 }
 0x4e4   : > { %7458 = vmatmul.mubr.msk.f32.vlgmr.msra.gmra.mxu0 %vm1301_vm2, %v9193_v26 }
 0x4e5   : > { %7466 = vmatpush3.xpose.msk.msra.mxu0 %vm1301_vm2, %v9208_v41  ;;  %7467 = vmatprep.mubr.msk.f32.mxu0 %vm8030_vm1, %v8029_v16 }
 0x4e6   : > { %7475 = vmatprep.subr.mxu0 %v8029_v16 }
 0x4e8   : > { %7468 = vmatmul.mubr.msk.f32.vlgmr.msra.gmra.mxu0 %vm1301_vm2, %v9208_v41 }
 0x4e9   : > { %7476 = vmatpush3.xpose.msk.msra.mxu0 %vm1301_vm2, %v9218_v46  ;;  %7477 = vmatprep.mubr.msk.f32.mxu0 %vm8030_vm1, %v8029_v16 }
 0x4ea   : > { %7485 = vmatprep.subr.mxu0 %v8029_v16 }
 0x4ec   : > { %7478 = vmatmul.mubr.msk.f32.vlgmr.msra.gmra.mxu0 %vm1301_vm2, %v9218_v46 }
 0x4ed   : > { %7486 = vmatpush3.msra.mxu0 %v9058_v22  ;;  %7487 = vmatprep.mubr.msk.f32.mxu0 %vm8030_vm1, %v8029_v16 }
 0x4ee   : > { %7495 = vmatprep.subr.mxu0 %v8029_v16 }
 0x547   : > { %v9233_v10 = vpop.f32.mrf.mxu1 }
 0x549   : > { %v7324_v47 = vpop.f32.mrf.mxu1 }
 0x54f   : > { %v9235_v34 = vpop.f32.mrf.mxu1 }
 0x551   : > { %v7334_v44 = vpop.f32.mrf.mxu1 }
 0x557   : > { %v9237_v7 = vpop.f32.mrf.mxu1 }
 0x559   : > { %v7344_v14 = vpop.f32.mrf.mxu1 }
 0x55f   : > { %v9239_v63 = vpop.f32.mrf.mxu1 }
 0x561   : > { %v7354_v23 = vpop.f32.mrf.mxu1 }
 0x567   : > { %v9241_v45 = vpop.f32.mrf.mxu1 }
 0x569   : > { %v7364_v53 = vpop.f32.mrf.mxu1 }
 0x56b   : > { %v9243_v48 = vpop.f32.mrf.mxu1 }
 0x56d   : > { %v7374_v50 = vpop.f32.mrf.mxu1 }
 0x56f   : > { %v9245_v6 = vpop.f32.mrf.mxu1 }
 0x570   : > { %v9247_v11 = vpop.f32.mrf.mxu0 }
 0x571   : > { %v7384_v61 = vpop.f32.mrf.mxu1 }
 0x572   : > { %v7329_v43 = vpop.f32.mrf.mxu0 }
 0x573   : > { %v9249_v18 = vpop.f32.mrf.mxu1 }
 0x574   : > { %v9251_v39 = vpop.f32.mrf.mxu0 }
 0x575   : > { %v7394_v24 = vpop.f32.mrf.mxu1 }
 0x576   : > { %v7339_v59 = vpop.f32.mrf.mxu0 }
 0x577   : > { %v3917_v37 = vpop.f32.mrf.mxu1 }
 0x578   : > { %v9253_v54 = vpop.f32.mrf.mxu0  ;;  %v9255_v35 = vmul.f32 0.5, %v3917_v37 }
 0x579   : > { %v7404_v62 = vpop.f32.mrf.mxu1 }
 0x57a   : > { %v7349_v0 = vpop.f32.mrf.mxu0  ;;  %v5047_v42 = vsel %vm2486_vm3, %v9255_v35, -inf }
 0x57b   : > { %5048 = vmax.xlane.f32.xlu0 %v5047_v42 }
 0x57c   : > { %v9259_v4 = vpop.f32.mrf.mxu0 }
 0x57e   : > { %v7359_v27 = vpop.f32.mrf.mxu0 }
 0x57f   : > { %v4065_v12 = vpop.f32.mrf.mxu1 }
 0x580   : > { %v9261_v58 = vmul.f32 0.5, %v4065_v12  ;;  %v9263_v30 = vpop.f32.mrf.mxu0 }
 0x581   : > { %v7414_v20 = vpop.f32.mrf.mxu1 }
 0x582   : > { %v7369_v19 = vpop.f32.mrf.mxu0  ;;  %v5053_v3 = vsel %vm2486_vm3, %v9261_v58, -inf }
 0x583   : > { %5054 = vmax.xlane.f32.xlu0 %v5053_v3  ;;  %v4213_v55 = vpop.f32.mrf.mxu1 }
 0x584   : > { %v9267_v15 = vpop.f32.mrf.mxu0  ;;  %v9279_v37 = vmul.f32 0.5, %v4213_v55 }
 0x585   : > { %v7424_v22 = vpop.f32.mrf.mxu1 }
 0x586   : > { %v7379_v1 = vpop.f32.mrf.mxu0  ;;  %v5059_v3 = vsel %vm2486_vm3, %v9279_v37, -inf }
 0x587   : > { %v4361_v56 = vpop.f32.mrf.mxu1 }
 0x588   : > { %v9269_v8 = vpop.f32.mrf.mxu0  ;;  %v9285_v19 = vmul.f32 0.5, %v4361_v56 }
 0x589   : > { %v7434_v52 = vpop.f32.mrf.mxu1 }
 0x58a   : > { %v7389_v40 = vpop.f32.mrf.mxu0 }
 0x58b   : > { %v4509_v9 = vpop.f32.mrf.mxu1 }
 0x58c   : > { %v9271_v21 = vpop.f32.mrf.mxu0  ;;  %v9293_v40 = vmul.f32 0.5, %v4509_v9 }
 0x58d   : > { %v7444_v13 = vpop.f32.mrf.mxu1 }
 0x58e   : > { %v7399_v28 = vpop.f32.mrf.mxu0  ;;  %v5065_v13 = vsel %vm2486_vm3, %v9285_v19, -inf }
 0x58f   : > { %v4657_v33 = vpop.f32.mrf.mxu1 }
 0x590   : > { %v3991_v47 = vpop.f32.mrf.mxu0 }
 0x591   : > { %v9273_v44 = vmul.f32 0.5, %v3991_v47  ;;  %v7454_v14 = vpop.f32.mrf.mxu1 }
 0x592   : > { %v7409_v23 = vpop.f32.mrf.mxu0 }
 0x593   : > { %v4805_v53 = vpop.f32.mrf.mxu1  ;;  %v5050_v50 = vsel %vm2486_vm3, %v9273_v44, -inf  ;;  %v9301_v23 = vmul.f32 0.5, %v4657_v33 }
 0x594   : > { %5051 = vmax.xlane.f32.xlu1 %v5050_v50  ;;  %v4139_v61 = vpop.f32.mrf.mxu0  ;;  %v5071_v50 = vsel %vm2486_vm3, %v9293_v40, -inf }
 0x595   : > { %v9277_v43 = vmul.f32 0.5, %v4139_v61  ;;  %v7464_v24 = vpop.f32.mrf.mxu1 }
 0x596   : > { %v7419_v59 = vpop.f32.mrf.mxu0 }
 0x597   : > { %v4953_v62 = vpop.f32.mrf.mxu1  ;;  %v5056_v0 = vsel %vm2486_vm3, %v9277_v43, -inf }
 0x598   : > { %5057 = vmax.xlane.f32.xlu0 %v5056_v0  ;;  %v4287_v42 = vpop.f32.mrf.mxu0  ;;  %v9309_v0 = vmul.f32 0.5, %v4805_v53 }
 0x599   : > { %v9283_v27 = vmul.f32 0.5, %v4287_v42  ;;  %v7474_v12 = vpop.f32.mrf.mxu1  ;;  %v5077_v42 = vsel %vm2486_vm3, %v9301_v23, -inf }
 0x59a   : > { %v7429_v20 = vpop.f32.mrf.mxu0 }
 0x59b   : > { %v5062_v22 = vsel %vm2486_vm3, %v9283_v27, -inf }
 0x59c   : > { %5060 = vmax.xlane.f32.xlu0 %v5059_v3  ;;  %5063 = vmax.xlane.f32.xlu1 %v5062_v22  ;;  %v4435_v55 = vpop.f32.mrf.mxu0  ;;  %v9317_v22 = vmul.f32 0.5, %v4953_v62 }
 0x59d   : > { %v9291_v1 = vmul.f32 0.5, %v4435_v55  ;;  %v5083_v55 = vsel %vm2486_vm3, %v9309_v0, -inf }
 0x59e   : > { %v7439_v52 = vpop.f32.mrf.mxu0 }
 0x59f   : > { %v5068_v56 = vsel %vm2486_vm3, %v9291_v1, -inf }
 0x5a0   : > { %5066 = vmax.xlane.f32.xlu0 %v5065_v13  ;;  %5069 = vmax.xlane.f32.xlu1 %v5068_v56  ;;  %v4583_v28 = vpop.f32.mrf.mxu0 }
 0x5a1   : > { %v9299_v47 = vmul.f32 0.5, %v4583_v28  ;;  %v5089_v28 = vsel %vm2486_vm3, %v9317_v22, -inf }
 0x5a2   : > { %v7449_v14 = vpop.f32.mrf.mxu0 }
 0x5a3   : > { %v5074_v9 = vsel %vm2486_vm3, %v9299_v47, -inf }
 0x5a4   : > { %5072 = vmax.xlane.f32.xlu0 %v5071_v50  ;;  %5075 = vmax.xlane.f32.xlu1 %v5074_v9  ;;  %v4731_v61 = vpop.f32.mrf.mxu0 }
 0x5a5   : > { %v9307_v24 = vmul.f32 0.5, %v4731_v61 }
 0x5a6   : > { %v7459_v59 = vpop.f32.mrf.mxu0 }
 0x5a7   : > { %v5080_v33 = vsel %vm2486_vm3, %v9307_v24, -inf }
 0x5a8   : > { %5078 = vmax.xlane.f32.xlu0 %v5077_v42  ;;  %5081 = vmax.xlane.f32.xlu1 %v5080_v33  ;;  %v4879_v12 = vpop.f32.mrf.mxu0 }
 0x5a9   : > { %v9315_v20 = vmul.f32 0.5, %v4879_v12 }
 0x5aa   : > { %v7469_v3 = vpop.f32.mrf.mxu0 }
 0x5ab   : > { %v5086_v53 = vsel %vm2486_vm3, %v9315_v20, -inf }
 0x5ac   : > { %5084 = vmax.xlane.f32.xlu0 %v5083_v55  ;;  %5087 = vmax.xlane.f32.xlu1 %v5086_v53  ;;  %v5027_v52 = vpop.f32.mrf.mxu0 }
 0x5ad   : > { %v9323_v13 = vmul.f32 0.5, %v5027_v52 }
 0x5ae   : > { %v7479_v56 = vpop.f32.mrf.mxu0 }
 0x5af   : > { %v5092_v14 = vsel %vm2486_vm3, %v9323_v13, -inf }
 0x5b0   : > { %5090 = vmax.xlane.f32.xlu0 %v5089_v28  ;;  %5093 = vmax.xlane.f32.xlu1 %v5092_v14 }
 0x604   : > { %v5049_v62 = vpop.xlane.xlu0 %5048 }
 0x605   : > { %v5095_v50 = vsub.f32 %v9255_v35, %v5049_v62 }
 0x607   : > { %v5111_v9 = vmul.f32 1.442695, %v5095_v50 }
 0x609   : > { %7762 = vpow2.f32 %v5111_v9 }
 0x60c   : > { %v5055_v61 = vpop.xlane.xlu0 %5054 }
 0x60d   : > { %v5097_v59 = vsub.f32 %v9261_v58, %v5055_v61 }
 0x60f   : > { %v5115_v42 = vmul.f32 1.442695, %v5097_v59 }
 0x611   : > { %7764 = vpow2.f32 %v5115_v42 }
 0x616   : > { %v9331_v33 = vpop.eup %7762 }
 0x617   : > { %v5143_v12 = vsel %vm2486_vm3, %v9331_v33, 0.0 }
 0x618   : > { %5144 = vadd.xlane.f32.xlu0 %v5143_v12 }
 0x61d   : > { %v5052_v3 = vpop.xlane.xlu1 %5051 }
 0x61e   : > { %v9335_v55 = vpop.eup %7764  ;;  %v5096_v53 = vsub.f32 %v9273_v44, %v5052_v3 }
 0x61f   : > { %v5149_v35 = vsel %vm2486_vm3, %v9335_v55, 0.0 }
 0x620   : > { %v5113_v52 = vmul.f32 1.442695, %v5096_v53  ;;  %5150 = vadd.xlane.f32.xlu0 %v5149_v35 }
 0x621   : > { %v5058_v56 = vpop.xlane.xlu0 %5057 }
 0x622   : > { %7766 = vpow2.f32 %v5113_v52  ;;  %v5098_v58 = vsub.f32 %v9277_v43, %v5058_v56 }
 0x624   : > { %v5117_v28 = vmul.f32 1.442695, %v5098_v58 }
 0x625   : > { %v5061_v14 = vpop.xlane.xlu0 %5060  ;;  %v5064_v62 = vpop.xlane.xlu1 %5063 }
 0x626   : > { %7768 = vpow2.f32 %v5117_v28  ;;  %v5099_v50 = vsub.f32 %v9279_v37, %v5061_v14  ;;  %v5100_v9 = vsub.f32 %v9283_v27, %v5064_v62 }
 0x628   : > { %v5119_v61 = vmul.f32 1.442695, %v5099_v50  ;;  %v5121_v59 = vmul.f32 1.442695, %v5100_v9 }
 0x629   : > { %v5067_v44 = vpop.xlane.xlu0 %5066  ;;  %v5070_v42 = vpop.xlane.xlu1 %5069 }
 0x62a   : > { %7770 = vpow2.f32 %v5119_v61  ;;  %v5101_v12 = vsub.f32 %v9285_v19, %v5067_v44  ;;  %v5102_v3 = vsub.f32 %v9291_v1, %v5070_v42 }
 0x62b   : > { %7772 = vpow2.f32 %v5121_v59 }
 0x62c   : > { %v5123_v53 = vmul.f32 1.442695, %v5101_v12  ;;  %v5125_v43 = vmul.f32 1.442695, %v5102_v3 }
 0x62d   : > { %v5073_v35 = vpop.xlane.xlu0 %5072  ;;  %v5076_v52 = vpop.xlane.xlu1 %5075 }
 0x62e   : > { %7774 = vpow2.f32 %v5123_v53  ;;  %v5103_v56 = vsub.f32 %v9293_v40, %v5073_v35  ;;  %v5104_v37 = vsub.f32 %v9299_v47, %v5076_v52 }
 0x62f   : > { %v9347_v27 = vpop.eup %7766  ;;  %7776 = vpow2.f32 %v5125_v43 }
 0x630   : > { %v5127_v58 = vmul.f32 1.442695, %v5103_v56  ;;  %v5129_v28 = vmul.f32 1.442695, %v5104_v37  ;;  %v5146_v19 = vsel %vm2486_vm3, %v9347_v27, 0.0 }
 0x631   : > { %v5079_v14 = vpop.xlane.xlu0 %5078  ;;  %5147 = vadd.xlane.f32.xlu1 %v5146_v19  ;;  %v5082_v1 = vpop.xlane.xlu1 %5081 }
 0x632   : > { %7778 = vpow2.f32 %v5127_v58  ;;  %v5105_v62 = vsub.f32 %v9301_v23, %v5079_v14  ;;  %v5106_v50 = vsub.f32 %v9307_v24, %v5082_v1 }
 0x633   : > { %v9353_v9 = vpop.eup %7768  ;;  %7780 = vpow2.f32 %v5129_v28 }
 0x634   : > { %v5131_v40 = vmul.f32 1.442695, %v5105_v62  ;;  %v5133_v47 = vmul.f32 1.442695, %v5106_v50  ;;  %v5152_v61 = vsel %vm2486_vm3, %v9353_v9, 0.0 }
 0x635   : > { %v5085_v59 = vpop.xlane.xlu0 %5084  ;;  %5153 = vadd.xlane.f32.xlu1 %v5152_v61  ;;  %v5088_v44 = vpop.xlane.xlu1 %5087 }
 0x636   : > { %7782 = vpow2.f32 %v5131_v40  ;;  %v5107_v42 = vsub.f32 %v9309_v0, %v5085_v59  ;;  %v5108_v12 = vsub.f32 %v9315_v20, %v5088_v44 }
 0x637   : > { %v9359_v3 = vpop.eup %7770  ;;  %7784 = vpow2.f32 %v5133_v47 }
 0x638   : > { %v9361_v23 = vpop.eup %7772  ;;  %v5135_v24 = vmul.f32 1.442695, %v5107_v42  ;;  %v5137_v53 = vmul.f32 1.442695, %v5108_v12  ;;  %v5155_v43 = vsel %vm2486_vm3, %v9359_v3, 0.0 }
 0x639   : > { %5156 = vadd.xlane.f32.xlu0 %v5155_v43  ;;  %v5091_v35 = vpop.xlane.xlu0 %5090  ;;  %v5158_v52 = vsel %vm2486_vm3, %v9361_v23, 0.0  ;;  %v5094_v56 = vpop.xlane.xlu1 %5093 }
 0x63a   : > { %7786 = vpow2.f32 %v5135_v24  ;;  %v5109_v0 = vsub.f32 %v9317_v22, %v5091_v35  ;;  %5159 = vadd.xlane.f32.xlu1 %v5158_v52  ;;  %v5110_v20 = vsub.f32 %v9323_v13, %v5094_v56 }
 0x63b   : > { %v9369_v37 = vpop.eup %7774  ;;  %7788 = vpow2.f32 %v5137_v53 }
 0x63c   : > { %v9371_v58 = vpop.eup %7776  ;;  %v5139_v28 = vmul.f32 1.442695, %v5109_v0  ;;  %v5141_v19 = vmul.f32 1.442695, %v5110_v20  ;;  %v5161_v14 = vsel %vm2486_vm3, %v9369_v37, 0.0 }
 0x63d   : > { %5162 = vadd.xlane.f32.xlu0 %v5161_v14  ;;  %v5164_v1 = vsel %vm2486_vm3, %v9371_v58, 0.0 }
 0x63e   : > { %7790 = vpow2.f32 %v5139_v28  ;;  %5165 = vadd.xlane.f32.xlu1 %v5164_v1 }
 0x63f   : > { %v9377_v22 = vpop.eup %7778  ;;  %7792 = vpow2.f32 %v5141_v19 }
 0x640   : > { %v9379_v13 = vpop.eup %7780  ;;  %v5167_v62 = vsel %vm2486_vm3, %v9377_v22, 0.0 }
 0x641   : > { %5168 = vadd.xlane.f32.xlu0 %v5167_v62  ;;  %v5170_v50 = vsel %vm2486_vm3, %v9379_v13, 0.0 }
 0x642   : > { %5171 = vadd.xlane.f32.xlu1 %v5170_v50 }
 0x643   : > { %v9385_v40 = vpop.eup %7782 }
 0x644   : > { %v9387_v47 = vpop.eup %7784  ;;  %v5173_v61 = vsel %vm2486_vm3, %v9385_v40, 0.0 }
 0x645   : > { %5174 = vadd.xlane.f32.xlu0 %v5173_v61  ;;  %v5176_v59 = vsel %vm2486_vm3, %v9387_v47, 0.0 }
 0x646   : > { %5177 = vadd.xlane.f32.xlu1 %v5176_v59 }
 0x647   : > { %v9393_v44 = vpop.eup %7786 }
 0x648   : > { %v9395_v42 = vpop.eup %7788  ;;  %v5179_v12 = vsel %vm2486_vm3, %v9393_v44, 0.0 }
 0x649   : > { %5180 = vadd.xlane.f32.xlu0 %v5179_v12  ;;  %v5182_v24 = vsel %vm2486_vm3, %v9395_v42, 0.0 }
 0x64a   : > { %5183 = vadd.xlane.f32.xlu1 %v5182_v24 }
 0x64b   : > { %v9401_v53 = vpop.eup %7790 }
 0x64c   : > { %v9403_v43 = vpop.eup %7792  ;;  %v5185_v35 = vsel %vm2486_vm3, %v9401_v53, 0.0 }
 0x64d   : > { %5186 = vadd.xlane.f32.xlu0 %v5185_v35  ;;  %v5188_v52 = vsel %vm2486_vm3, %v9403_v43, 0.0 }
 0x64e   : > { %5189 = vadd.xlane.f32.xlu1 %v5188_v52 }
 0x6a1   : > { %v5145_v56 = vpop.xlane.xlu0 %5144 }
 0x6a2   : > { %7794 = vrcp.f32 %v5145_v56 }
 0x6a9   : > { %v5151_v0 = vpop.xlane.xlu0 %5150 }
 0x6aa   : > { %7796 = vrcp.f32 %v5151_v0 }
 0x6af   : > { %v7795_v20 = vpop.eup %7794 }
 0x6b0   : > { %v5223_v28 = vmul.f32 %v7795_v20, %v9331_v33 }
 0x6b2   : > { %7483 = vmatmul.mubr.msk.f32.vlgmr.msra.gmra.mxu1 %vm2486_vm3, %v5223_v28 }
 0x6b3   : > { %7491 = vmatpush3.msra.mxu1 %v9073_v5  ;;  %7492 = vmatprep.mubr.msk.f32.mxu1 %vm8030_vm1, %v8029_v16 }
 0x6b4   : > { %7500 = vmatprep.subr.mxu1 %v8029_v16 }
 0x6b7   : > { %v7797_v19 = vpop.eup %7796 }
 0x6b8   : > { %v5225_v14 = vmul.f32 %v7797_v19, %v9335_v55 }
 0x6ba   : > { %7493 = vmatmul.mubr.msk.f32.vlgmr.msra.gmra.mxu1 %vm2486_vm3, %v5225_v14  ;;  %v5148_v1 = vpop.xlane.xlu1 %5147 }
 0x6bb   : > { %7501 = vmatpush3.msra.mxu1 %v9049_v25  ;;  %7798 = vrcp.f32 %v5148_v1  ;;  %7502 = vmatprep.mubr.msk.f32.mxu1 %vm8030_vm1, %v8029_v16 }
 0x6bc   : > { %7510 = vmatprep.subr.mxu1 %v8029_v16 }
 0x6be   : > { %v5154_v5 = vpop.xlane.xlu1 %5153 }
 0x6bf   : > { %7800 = vrcp.f32 %v5154_v5 }
 0x6c2   : > { %v5157_v33 = vpop.xlane.xlu0 %5156 }
 0x6c3   : > { %7802 = vrcp.f32 %v5157_v33  ;;  %v5160_v62 = vpop.xlane.xlu1 %5159 }
 0x6c4   : > { %7804 = vrcp.f32 %v5160_v62 }
 0x6c6   : > { %v5163_v50 = vpop.xlane.xlu0 %5162 }
 0x6c7   : > { %7806 = vrcp.f32 %v5163_v50  ;;  %v5166_v55 = vpop.xlane.xlu1 %5165 }
 0x6c8   : > { %v7799_v61 = vpop.eup %7798  ;;  %7808 = vrcp.f32 %v5166_v55 }
 0x6c9   : > { %v5224_v59 = vmul.f32 %v7799_v61, %v9347_v27 }
 0x6ca   : > { %v5169_v25 = vpop.xlane.xlu0 %5168 }
 0x6cb   : > { %7810 = vrcp.f32 %v5169_v25  ;;  %v5172_v12 = vpop.xlane.xlu1 %5171  ;;  %7488 = vmatmul.mubr.msk.f32.vlgmr.msra.gmra.mxu0 %vm2486_vm3, %v5224_v59 }
 0x6cc   : > { %v7801_v24 = vpop.eup %7800  ;;  %7812 = vrcp.f32 %v5172_v12  ;;  %7496 = vmatpush3.msra.mxu0 %v9101_v51  ;;  %7497 = vmatprep.mubr.msk.f32.mxu0 %vm8030_vm1, %v8029_v16 }
 0x6cd   : > { %7505 = vmatprep.subr.mxu0 %v8029_v16  ;;  %v5226_v35 = vmul.f32 %v7801_v24, %v9353_v9 }
 0x6ce   : > { %v5175_v52 = vpop.xlane.xlu0 %5174 }
 0x6cf   : > { %7814 = vrcp.f32 %v5175_v52  ;;  %v5178_v56 = vpop.xlane.xlu1 %5177  ;;  %7498 = vmatmul.mubr.msk.f32.vlgmr.msra.gmra.mxu0 %vm2486_vm3, %v5226_v35 }
 0x6d0   : > { %v7803_v27 = vpop.eup %7802  ;;  %7816 = vrcp.f32 %v5178_v56  ;;  %7506 = vmatpush3.msra.mxu0 %v9124_v17  ;;  %7507 = vmatprep.mubr.msk.f32.mxu0 %vm8030_vm1, %v8029_v16 }
 0x6d1   : > { %v7805_v51 = vpop.eup %7804  ;;  %7515 = vmatprep.subr.mxu0 %v8029_v16  ;;  %v5227_v0 = vmul.f32 %v7803_v27, %v9359_v3 }
 0x6d2   : > { %v5181_v20 = vpop.xlane.xlu0 %5180  ;;  %v5228_v9 = vmul.f32 %v7805_v51, %v9361_v23 }
 0x6d3   : > { %7818 = vrcp.f32 %v5181_v20  ;;  %v5184_v28 = vpop.xlane.xlu1 %5183  ;;  %7503 = vmatmul.mubr.msk.f32.vlgmr.msra.gmra.mxu1 %vm2486_vm3, %v5227_v0 }
 0x6d4   : > { %v7807_v19 = vpop.eup %7806  ;;  %7820 = vrcp.f32 %v5184_v28  ;;  %7508 = vmatmul.mubr.msk.f32.vlgmr.msra.gmra.mxu0 %vm2486_vm3, %v5228_v9  ;;  %7511 = vmatpush3.msra.mxu1 %v9071_v49 }
 0x6d5   : > { %v7809_v17 = vpop.eup %7808  ;;  %7516 = vmatpush3.msra.mxu0 %v9148_v38  ;;  %7512 = vmatprep.mubr.msk.f32.mxu1 %vm8030_vm1, %v8029_v16  ;;  %v5229_v3 = vmul.f32 %v7807_v19, %v9369_v37 }
 0x6d6   : > { %7520 = vmatprep.subr.mxu1 %v8029_v16  ;;  %v5187_v23 = vpop.xlane.xlu0 %5186  ;;  %7517 = vmatprep.mubr.msk.f32.mxu0 %vm8030_vm1, %v8029_v16  ;;  %v5230_v14 = vmul.f32 %v7809_v17, %v9371_v58 }
 0x6d7   : > { %7822 = vrcp.f32 %v5187_v23  ;;  %7525 = vmatprep.subr.mxu0 %v8029_v16  ;;  %v5190_v49 = vpop.xlane.xlu1 %5189  ;;  %7513 = vmatmul.mubr.msk.f32.vlgmr.msra.gmra.mxu1 %vm2486_vm3, %v5229_v3 }
 0x6d8   : > { %v7811_v38 = vpop.eup %7810  ;;  %7824 = vrcp.f32 %v5190_v49  ;;  %7518 = vmatmul.mubr.msk.f32.vlgmr.msra.gmra.mxu0 %vm2486_vm3, %v5230_v14  ;;  %7521 = vmatpush3.msra.mxu1 %v9089_v29 }
 0x6d9   : > { %v7813_v37 = vpop.eup %7812  ;;  %7526 = vmatpush3.msra.mxu0 %v9174_v32  ;;  %7522 = vmatprep.mubr.msk.f32.mxu1 %vm8030_vm1, %v8029_v16  ;;  %v5231_v58 = vmul.f32 %v7811_v38, %v9377_v22 }
 0x6da   : > { %7527 = vmatprep.mubr.msk.f32.mxu0 %vm8030_vm1, %v8029_v16  ;;  %7530 = vmatprep.subr.mxu1 %v8029_v16  ;;  %v5232_v1 = vmul.f32 %v7813_v37, %v9379_v13 }
 0x6db   : > { %7535 = vmatprep.subr.mxu0 %v8029_v16  ;;  %7523 = vmatmul.mubr.msk.f32.vlgmr.msra.gmra.mxu1 %vm2486_vm3, %v5231_v58 }
 0x6dc   : > { %v7815_v29 = vpop.eup %7814  ;;  %7528 = vmatmul.mubr.msk.f32.vlgmr.msra.gmra.mxu0 %vm2486_vm3, %v5232_v1  ;;  %7531 = vmatpush3.msra.mxu1 %v9113_v31 }
 0x6dd   : > { %v7817_v32 = vpop.eup %7816  ;;  %7536 = vmatpush3.msra.mxu0 %v9193_v26  ;;  %7532 = vmatprep.mubr.msk.f32.mxu1 %vm8030_vm1, %v8029_v16  ;;  %v5233_v22 = vmul.f32 %v7815_v29, %v9385_v40 }
 0x6de   : > { %7537 = vmatprep.mubr.msk.f32.mxu0 %vm8030_vm1, %v8029_v16  ;;  %7540 = vmatprep.subr.mxu1 %v8029_v16  ;;  %v5234_v13 = vmul.f32 %v7817_v32, %v9387_v47 }
 0x6df   : > { %7545 = vmatprep.subr.mxu0 %v8029_v16  ;;  %7533 = vmatmul.mubr.msk.f32.vlgmr.msra.gmra.mxu1 %vm2486_vm3, %v5233_v22 }
 0x6e0   : > { %v7819_v31 = vpop.eup %7818  ;;  %7538 = vmatmul.mubr.msk.f32.vlgmr.msra.gmra.mxu0 %vm2486_vm3, %v5234_v13  ;;  %7541 = vmatpush3.msra.mxu1 %v9136_v60 }
 0x6e1   : > { %v7821_v26 = vpop.eup %7820  ;;  %7546 = vmatpush3.msra.mxu0 %v9208_v41  ;;  %7542 = vmatprep.mubr.msk.f32.mxu1 %vm8030_vm1, %v8029_v16  ;;  %v5235_v40 = vmul.f32 %v7819_v31, %v9393_v44 }
 0x6e2   : > { %7547 = vmatprep.mubr.msk.f32.mxu0 %vm8030_vm1, %v8029_v16  ;;  %7550 = vmatprep.subr.mxu1 %v8029_v16  ;;  %v5236_v47 = vmul.f32 %v7821_v26, %v9395_v42 }
 0x6e3   : > { %7555 = vmatprep.subr.mxu0 %v8029_v16  ;;  %7543 = vmatmul.mubr.msk.f32.vlgmr.msra.gmra.mxu1 %vm2486_vm3, %v5235_v40 }
 0x6e4   : > { %v7823_v60 = vpop.eup %7822  ;;  %7548 = vmatmul.mubr.msk.f32.vlgmr.msra.gmra.mxu0 %vm2486_vm3, %v5236_v47  ;;  %7551 = vmatpush3.msra.mxu1 %v9161_v2 }
 0x6e5   : > { %v7825_v41 = vpop.eup %7824  ;;  %7556 = vmatpush3.msra.mxu0 %v9218_v46  ;;  %7552 = vmatprep.mubr.msk.f32.mxu1 %vm8030_vm1, %v8029_v16  ;;  %v5237_v44 = vmul.f32 %v7823_v60, %v9401_v53 }
 0x6e6   : > { %7557 = vmatprep.mubr.msk.f32.mxu0 %vm8030_vm1, %v8029_v16  ;;  %v5238_v42 = vmul.f32 %v7825_v41, %v9403_v43 }
 0x6e7   : > { %7553 = vmatmul.mubr.msk.f32.vlgmr.msra.gmra.mxu1 %vm2486_vm3, %v5237_v44 }
 0x6e8   : > { %7558 = vmatmul.mubr.msk.f32.vlgmr.msra.gmra.mxu0 %vm2486_vm3, %v5238_v42 }
 0x772   : > { %v5309_v5 = vpop.f32.mrf.mxu1 }
 0x773   : > { %6439 = vrot.lane.b32.xlu0 %v5309_v5, %s8034_s12 }
 0x774   : > { %v7484_v2 = vpop.f32.mrf.mxu1 }
 0x77a   : > { %v5457_v46 = vpop.f32.mrf.mxu1 }
 0x77c   : > { %v7494_v33 = vpop.f32.mrf.mxu1 }
 0x78b   : > { %v5383_v62 = vpop.f32.mrf.mxu0 }
 0x78c   : > { %6441 = vrot.lane.b32.xlu1 %v5383_v62, %s8034_s12 }
 0x78d   : > { %v7489_v53 = vpop.f32.mrf.mxu0 }
 0x78f   : > { %v5531_v50 = vpop.f32.mrf.mxu0 }
 0x790   : > { %6443 = vrot.lane.b32.xlu1 %v5457_v46, %s8034_s12 }
 0x791   : > { %v7499_v16 = vpop.f32.mrf.mxu0 }
 0x793   : > { %v5605_v43 = vpop.f32.mrf.mxu1 }
 0x794   : > { %v5679_v55 = vpop.f32.mrf.mxu0  ;;  %6447 = vrot.lane.b32.xlu0 %v5605_v43, %s8034_s12  ;;  %6445 = vrot.lane.b32.xlu1 %v5531_v50, %s8034_s12 }
 0x795   : > { %v7504_v61 = vpop.f32.mrf.mxu1 }
 0x796   : > { %v7509_v59 = vpop.f32.mrf.mxu0 }
 0x797   : > { %v5753_v25 = vpop.f32.mrf.mxu1 }
 0x798   : > { %v5827_v12 = vpop.f32.mrf.mxu0  ;;  %6451 = vrot.lane.b32.xlu0 %v5753_v25, %s8034_s12  ;;  %6449 = vrot.lane.b32.xlu1 %v5679_v55, %s8034_s12 }
 0x799   : > { %v7514_v24 = vpop.f32.mrf.mxu1 }
 0x79a   : > { %v7519_v35 = vpop.f32.mrf.mxu0 }
 0x79b   : > { %v5901_v52 = vpop.f32.mrf.mxu1 }
 0x79c   : > { %v5975_v56 = vpop.f32.mrf.mxu0  ;;  %6455 = vrot.lane.b32.xlu0 %v5901_v52, %s8034_s12  ;;  %6453 = vrot.lane.b32.xlu1 %v5827_v12, %s8034_s12 }
 0x79d   : > { %v7524_v27 = vpop.f32.mrf.mxu1 }
 0x79e   : > { %v7529_v51 = vpop.f32.mrf.mxu0 }
 0x79f   : > { %v6049_v0 = vpop.f32.mrf.mxu1 }
 0x7a0   : > { %v6123_v20 = vpop.f32.mrf.mxu0  ;;  %6459 = vrot.lane.b32.xlu0 %v6049_v0, %s8034_s12  ;;  %6457 = vrot.lane.b32.xlu1 %v5975_v56, %s8034_s12 }
 0x7a1   : > { %v7534_v9 = vpop.f32.mrf.mxu1 }
 0x7a2   : > { %v7539_v28 = vpop.f32.mrf.mxu0 }
 0x7a3   : > { %v6197_v19 = vpop.f32.mrf.mxu1 }
 0x7a4   : > { %v6271_v17 = vpop.f32.mrf.mxu0  ;;  %6463 = vrot.lane.b32.xlu0 %v6197_v19, %s8034_s12  ;;  %6461 = vrot.lane.b32.xlu1 %v6123_v20, %s8034_s12 }
 0x7a5   : > { %v7544_v3 = vpop.f32.mrf.mxu1 }
 0x7a6   : > { %v7549_v23 = vpop.f32.mrf.mxu0 }
 0x7a7   : > { %v6345_v14 = vpop.f32.mrf.mxu1 }
 0x7a8   : > { %v6419_v49 = vpop.f32.mrf.mxu0  ;;  %6467 = vrot.lane.b32.xlu0 %v6345_v14, %s8034_s12  ;;  %6465 = vrot.lane.b32.xlu1 %v6271_v17, %s8034_s12 }
 0x7a9   : > { %v7554_v38 = vpop.f32.mrf.mxu1 }
 0x7aa   : > { %v7559_v37 = vpop.f32.mrf.mxu0 }
 0x7ac   : > { %6469 = vrot.lane.b32.xlu1 %v6419_v49, %s8034_s12 }
 0x7e5   : > { %v6440_v1 = vpop.permute.xlu0 %6439 }
 0x7e6   : > { %v6487_v60 = vsel %vm1301_vm2, %v9233_v10, %v6440_v1 }
 0x7fe   : > { %v6442_v58 = vpop.permute.xlu1 %6441 }
 0x7ff   : > { %v6488_v31 = vsel %vm1301_vm2, %v9247_v11, %v6442_v58 }
 0x802   : > { %v6444_v29 = vpop.permute.xlu1 %6443 }
 0x803   : > { %v6489_v26 = vsel %vm1301_vm2, %v9235_v34, %v6444_v29 }
 0x804   : > { %v6503_v42 = vcombine.low %v6487_v60, %v6489_v26  ;;  %v6504_v5 = vcombine.high %v6487_v60, %v6489_v26 }
 0x806   : > { %v6448_v32 = vpop.permute.xlu0 %6447  ;;  %v6446_v22 = vpop.permute.xlu1 %6445  ;;  %v6511_v10 = vrot.slane %v6503_v42, %v8592_v57  ;;  %v6518_v50 = vrot.slane %v6504_v5, %v8592_v57 }
 0x807   : > { %v6490_v13 = vsel %vm1301_vm2, %v9251_v39, %v6446_v22  ;;  %v6491_v39 = vsel %vm1301_vm2, %v9237_v7, %v6448_v32 }
 0x808   : > { %v6519_v40 = vcombine.low %v6488_v31, %v6490_v13  ;;  %v6520_v47 = vcombine.high %v6488_v31, %v6490_v13 }
 0x80a   : > { %v6452_v41 = vpop.permute.xlu0 %6451  ;;  %v6450_v44 = vpop.permute.xlu1 %6449  ;;  %v6527_v11 = vrot.slane %v6519_v40, %v8592_v57  ;;  %v6534_v46 = vrot.slane %v6520_v47, %v8592_v57 }
 0x80b   : > { %v6493_v2 = vsel %vm1301_vm2, %v9239_v63, %v6452_v41  ;;  %v6492_v16 = vsel %vm1301_vm2, %v9253_v54, %v6450_v44 }
 0x80c   : > { %v6535_v34 = vcombine.low %v6491_v39, %v6493_v2  ;;  %v6536_v33 = vcombine.high %v6491_v39, %v6493_v2  ;;  %v6567_v55 = vcombine.low %v6511_v10, %v6527_v11  ;;  %v6568_v61 = vcombine.high %v6511_v10, %v6527_v11 }
 0x80d   : > { %v6583_v59 = vcombine.low %v6518_v50, %v6534_v46  ;;  %v6584_v27 = vcombine.high %v6518_v50, %v6534_v46 }
 0x80e   : > { %v6456_v62 = vpop.permute.xlu0 %6455  ;;  %v6454_v53 = vpop.permute.xlu1 %6453  ;;  %v6543_v25 = vrot.slane %v6535_v34, %v8592_v57  ;;  %v6550_v12 = vrot.slane %v6536_v33, %v8592_v57  ;;  %v6575_v20 = vrot.slane %v6567_v55, %v8609_v36  ;;  %v6582_v9 = vrot.slane %v6568_v61, %v8609_v36 }
 0x80f   : > { %v6494_v63 = vsel %vm1301_vm2, %v9259_v4, %v6454_v53  ;;  %v6591_v28 = vrot.slane %v6583_v59, %v8609_v36  ;;  %v6598_v38 = vrot.slane %v6584_v27, %v8609_v36  ;;  %v6495_v60 = vsel %vm1301_vm2, %v9241_v45, %v6456_v62 }
 0x810   : > { %v6551_v43 = vcombine.low %v6492_v16, %v6494_v63  ;;  %v6552_v7 = vcombine.high %v6492_v16, %v6494_v63 }
 0x812   : > { %v6559_v24 = vrot.slane %v6551_v43, %v8592_v57  ;;  %v6566_v35 = vrot.slane %v6552_v7, %v8592_v57  ;;  %v6460_v52 = vpop.permute.xlu0 %6459  ;;  %v6458_v56 = vpop.permute.xlu1 %6457 }
 0x813   : > { %v6497_v37 = vsel %vm1301_vm2, %v9243_v48, %v6460_v52  ;;  %v6496_v58 = vsel %vm1301_vm2, %v9263_v30, %v6458_v56 }
 0x814   : > { %v6599_v54 = vcombine.low %v6543_v25, %v6559_v24  ;;  %v6600_v51 = vcombine.high %v6543_v25, %v6559_v24  ;;  %v6615_v0 = vcombine.low %v6550_v12, %v6566_v35  ;;  %v6616_v4 = vcombine.high %v6550_v12, %v6566_v35 }
 0x815   : > { %v6639_v41 = vcombine.low %v6495_v60, %v6497_v37  ;;  %v6640_v5 = vcombine.high %v6495_v60, %v6497_v37 }
 0x816   : > { %v6607_v19 = vrot.slane %v6599_v54, %v8609_v36  ;;  %v6614_v17 = vrot.slane %v6600_v51, %v8609_v36  ;;  %v6623_v3 = vrot.slane %v6615_v0, %v8609_v36  ;;  %v6630_v23 = vrot.slane %v6616_v4, %v8609_v36  ;;  %v6464_v14 = vpop.permute.xlu0 %6463  ;;  %v6462_v49 = vpop.permute.xlu1 %6461 }
 0x817   : > { %v6498_v1 = vsel %vm1301_vm2, %v9267_v15, %v6462_v49  ;;  %v6499_v2 = vsel %vm1301_vm2, %v9245_v6, %v6464_v14  ;;  %v6647_v33 = vrot.slane %v6639_v41, %v8592_v57  ;;  %v6654_v6 = vrot.slane %v6640_v5, %v8592_v57 }
 0x818   : > { %v6631_v29 = vcombine.low %v6575_v20, %v6607_v19  ;;  %v6632_v32 = vcombine.high %v6575_v20, %v6607_v19  ;;  %v6633_v22 = vcombine.low %v6582_v9, %v6614_v17  ;;  %v6634_v13 = vcombine.high %v6582_v9, %v6614_v17 }
 0x819   : > { %v6635_v31 = vcombine.low %v6591_v28, %v6623_v3  ;;  %v6636_v26 = vcombine.high %v6591_v28, %v6623_v3  ;;  %v6637_v40 = vcombine.low %v6598_v38, %v6630_v23  ;;  %v6638_v47 = vcombine.high %v6598_v38, %v6630_v23 }
 0x81a   : > { %6775 = vst.msk [vmem:[%s9551_s30] sm:$0xff] %vm350_vm0, %v6631_v29  ;;  %6777 = vst.msk [vmem:[%s9551_s30 + $0x10] sm:$0xff] %vm350_vm0, %v6632_v32  ;;  %v6655_v48 = vcombine.low %v6496_v58, %v6498_v1  ;;  %v6468_v30 = vpop.permute.xlu0 %6467  ;;  %v6466_v15 = vpop.permute.xlu1 %6465  ;;  %v6656_v44 = vcombine.high %v6496_v58, %v6498_v1 }
 0x81b   : > { %6779 = vst.msk [vmem:[%s9551_s30 + $0x20] sm:$0xff] %vm350_vm0, %v6633_v22  ;;  %6781 = vst.msk [vmem:[%s9551_s30 + $0x30] sm:$0xff] %vm350_vm0, %v6634_v13  ;;  %v6501_v42 = vsel %vm1301_vm2, %v9249_v18, %v6468_v30  ;;  %v6500_v53 = vsel %vm1301_vm2, %v9269_v8, %v6466_v15 }
 0x81c   : > { %6783 = vst.msk [vmem:[%s9551_s30 + $0x40] sm:$0xff] %vm350_vm0, %v6635_v31  ;;  %6785 = vst.msk [vmem:[%s9551_s30 + $0x50] sm:$0xff] %vm350_vm0, %v6636_v26  ;;  %v6663_v39 = vrot.slane %v6655_v48, %v8592_v57  ;;  %v6671_v11 = vcombine.low %v6499_v2, %v6501_v42  ;;  %v6672_v46 = vcombine.high %v6499_v2, %v6501_v42 }
 0x81d   : > { %6787 = vst.msk [vmem:[%s9551_s30 + $0x60] sm:$0xff] %vm350_vm0, %v6637_v40  ;;  %6789 = vst.msk [vmem:[%s9551_s30 + $0x70] sm:$0xff] %vm350_vm0, %v6638_v47  ;;  %v6670_v62 = vrot.slane %v6656_v44, %v8592_v57 }
 0x81e   : > { %v6470_v45 = vpop.permute.xlu1 %6469  ;;  %v6703_v50 = vcombine.low %v6647_v33, %v6663_v39  ;;  %v6704_v16 = vcombine.high %v6647_v33, %v6663_v39  ;;  %v6679_v63 = vrot.slane %v6671_v11, %v8592_v57  ;;  %v6686_v43 = vrot.slane %v6672_v46, %v8592_v57 }
 0x81f   : > { %v6502_v34 = vsel %vm1301_vm2, %v9271_v21, %v6470_v45  ;;  %v6719_v55 = vcombine.low %v6654_v6, %v6670_v62  ;;  %v6720_v61 = vcombine.high %v6654_v6, %v6670_v62 }
 0x820   : > { %v6687_v18 = vcombine.low %v6500_v53, %v6502_v34  ;;  %v6688_v10 = vcombine.high %v6500_v53, %v6502_v34  ;;  %v6711_v24 = vrot.slane %v6703_v50, %v8609_v36  ;;  %v6718_v35 = vrot.slane %v6704_v16, %v8609_v36 }
 0x821   : > { %v6727_v54 = vrot.slane %v6719_v55, %v8609_v36  ;;  %v6734_v51 = vrot.slane %v6720_v61, %v8609_v36 }
 0x822   : > { %v6695_v21 = vrot.slane %v6687_v18, %v8592_v57  ;;  %v6702_v7 = vrot.slane %v6688_v10, %v8592_v57 }
 0x824   : > { %v6735_v59 = vcombine.low %v6679_v63, %v6695_v21  ;;  %v6736_v8 = vcombine.high %v6679_v63, %v6695_v21  ;;  %v6751_v25 = vcombine.low %v6686_v43, %v6702_v7  ;;  %v6752_v12 = vcombine.high %v6686_v43, %v6702_v7 }
 0x826   : > { %v6743_v52 = vrot.slane %v6735_v59, %v8609_v36  ;;  %v6750_v56 = vrot.slane %v6736_v8, %v8609_v36  ;;  %v6759_v57 = vrot.slane %v6751_v25, %v8609_v36  ;;  %v6766_v27 = vrot.slane %v6752_v12, %v8609_v36 }
 0x828   : > { %v6767_v0 = vcombine.low %v6711_v24, %v6743_v52  ;;  %v6768_v4 = vcombine.high %v6711_v24, %v6743_v52  ;;  %v6769_v20 = vcombine.low %v6718_v35, %v6750_v56  ;;  %v6770_v9 = vcombine.high %v6718_v35, %v6750_v56 }
 0x829   : > { %v6771_v28 = vcombine.low %v6727_v54, %v6759_v57  ;;  %v6772_v36 = vcombine.high %v6727_v54, %v6759_v57  ;;  %v6773_v19 = vcombine.low %v6734_v51, %v6766_v27  ;;  %v6774_v17 = vcombine.high %v6734_v51, %v6766_v27 }
 0x82a   : > { %6776 = vst.msk [vmem:[%s9551_s30 + $0x8] sm:$0xff] %vm350_vm0, %v6767_v0  ;;  %6778 = vst.msk [vmem:[%s9551_s30 + $0x18] sm:$0xff] %vm350_vm0, %v6768_v4 }
 0x82b   : > { %6780 = vst.msk [vmem:[%s9551_s30 + $0x28] sm:$0xff] %vm350_vm0, %v6769_v20  ;;  %6782 = vst.msk [vmem:[%s9551_s30 + $0x38] sm:$0xff] %vm350_vm0, %v6770_v9 }
 0x82c   : > { %6784 = vst.msk [vmem:[%s9551_s30 + $0x48] sm:$0xff] %vm350_vm0, %v6771_v28  ;;  %6786 = vst.msk [vmem:[%s9551_s30 + $0x58] sm:$0xff] %vm350_vm0, %v6772_v36 }
 0x82d   : > { %6788 = vst.msk [vmem:[%s9551_s30 + $0x68] sm:$0xff] %vm350_vm0, %v6773_v19  ;;  %6790 = vst.msk [vmem:[%s9551_s30 + $0x78] sm:$0xff] %vm350_vm0, %v6774_v17 }
 0x82e   : > { %7945 = shalt.err (!%p7942_p8)
}
 0x82f   : > { %s7946_s29 = scalar_lea.hbm %s9600_s16, 2048  ;;  %s7950_s11 = scalar_lea.hbm %s9672_s6, 4096 }
 0x830   : > { %p7947_p12 = scmp.ne.s32.totalorder %s9600_s16, %s7946_s29  ;;  %p7951_p10 = scmp.lt.s32.totalorder %s9600_s16, %s9672_s6 }
 0x831   : > { %p7952_p0 = scmp.lt.s32.totalorder %s7950_s11, %s7946_s29 }
 0x832   : > { %p7948_p5 = pnand %p7947_p12, %p8183_p13 }
 0x833   : > { %p7953_p9 = por %p7952_p0, %p7951_p10 }
 0x834   : > { %p7949_p7 = pneg %p7948_p5 }
 0x836   : > { %p7954_p1 = pnand %p7953_p9, %p7949_p7 }
 0x838   : > { %7957 = shalt.err (!%p7954_p1)
}
 0x839   : > { %s8036_s20 = smov 128   ;;  %s8037_s24 = smov 8  }
 0x83a   : > { %7574 = dma.vmem_to_hbm [thread:$0]  (%p8183_p13), %s9602_s17, 2048, %s9600_s16, %s6792_s10, %s8036_s20, %s8036_s20, %s8037_s24  }
 0x83b PF: > { %s6822_s27 = sand.u32 1, %s8000_s21   ;;  %p9697_p11 = scmp.ne.s32.totalorder %s9684_s8, 0 }
 0x83c   : > { %p9698_p6 = scmp.ge.s32.totalorder %s8020_s26, 2  ;;  %s6823_s2 = scalar_lea.sflag [#allocation4], %s6822_s27 }
 0x83e   : > { %p7591_p3 = pnand %p9698_p6, %p9697_p11 }
 0x840   : > { %p7592_p4 = pneg %p7591_p3 }
 0x842   : > { %7995 = dma.done.wait (%p7592_p4), %s6823_s2, 2048  }
 0x843   : > { %7997 = vsyncadd (%p7592_p4), %s6823_s2, 4294965248  ;;  %s24_s26 = sadd.s32 1, %s8020_s26   ;;  %s9699_s21 = smov %s8004_s22 }
 0x844   : > { %p21_p2 = scmp.ge.s32.totalorder %s24_s26, 4   ;;  %s9700_s22 = smov %s8008_s23 }
 0x845   : > { %s9701_s23 = smov %s8195_s28  ;;  %s9702_s24 = smov %s8016_s25 }
 0x846   : > { %s9703_s25 = smov %s9705_s18  ;;  %23 = sbr.rel (!%p21_p2) target bundleno = 11 (0xb), region = 101 }
 0x84b   :  { %6828 = vsyncpa [#allocation3], 1 }
 0x84c   :  { %6830 = vsyncpa [#allocation3 + $0x1], 1 }
 0x84d   :  { %6831 = vsyncpa [#allocation6], 1 }
 0x84e   :  { %6832 = vsyncpa [#allocation9], 1 }
 0x84f   :  { %6833 = vsyncpa [#allocation4], 1 }
 0x850   :  { %6835 = vsyncpa [#allocation4 + $0x1], 1 }

</bundles_post_ra>
